<compile_context>
chip_gen: v7x
topology: tpu7x:2x2x1
jax: 0.10.0
libtpu: 0.0.40
codegen_flags: <defaults>
</compile_context>

<pallas_src>
import functools
import math

import jax
import jax.numpy as jnp
from jax import lax
from jax.experimental import pallas as pl
from jax.experimental.pallas import tpu as pltpu


# ------------------------------ helpers ------------------------------------ #

def _round_up(x, m):
    return ((x + m - 1) // m) * m


def _pad_to(x, axis, size):
    pad = size - x.shape[axis]
    if pad <= 0:
        return x
    widths = [(0, 0)] * x.ndim
    widths[axis] = (0, pad)
    return jnp.pad(x, widths)


# ------------------------------ fused kernel ------------------------------- #

def _attention_kernel(in_ref, w_in_ref, out_ref, w_out_ref, ctx_ref,
                      proj_o_ref, m_ref, l_ref, acc_ref, *, n_valid, tn):
    """One (M-tile, N-tile) grid step.

    grid = (M/tm  ["parallel"],  N/tn  ["arbitrary" reduction, online softmax]).
    """
    j = pl.program_id(1)
    bf16 = jnp.bfloat16

    @pl.when(j == 0)
    def _init():
        # Output projection for this M tile: computed once per M tile, cached
        # as bf16 in VMEM scratch.  Gate depends only on the serial reduction
        # axis, so the M axis can be megacore-parallel safely.
        proj_o_ref[...] = jnp.dot(
            out_ref[...].astype(bf16), w_out_ref[...].astype(bf16),
            preferred_element_type=jnp.float32).astype(bf16)
        m_ref[...] = jnp.full(m_ref.shape, -jnp.inf, dtype=jnp.float32)
        l_ref[...] = jnp.zeros(l_ref.shape, dtype=jnp.float32)
        acc_ref[...] = jnp.zeros(acc_ref.shape, dtype=jnp.float32)

    # Input projection for this N tile (bf16 MXU operands, f32 accumulation).
    proj_i = jnp.dot(in_ref[...].astype(bf16), w_in_ref[...].astype(bf16),
                     preferred_element_type=jnp.float32).astype(bf16)   # (tn, D)

    # scores[m, n] = <proj_o[m, :], proj_i[n, :]>   (flash-style Q @ K^T form)
    s = lax.dot_general(proj_o_ref[...], proj_i,
                        (((1,), (1,)), ((), ())),
                        preferred_element_type=jnp.float32)             # (tm, tn)

    if n_valid % tn:
        # Static branch: inputs were zero-padded along N; padded columns must
        # carry zero softmax weight.
        n_idx = j * tn + lax.broadcasted_iota(jnp.int32, s.shape, 1)
        s = jnp.where(n_idx < n_valid, s, -jnp.inf)

    # Online softmax over the N (reduction) axis == torch softmax(dim=1).
    m_prev = m_ref[...]
    m_new = jnp.maximum(m_prev, jnp.max(s, axis=-1, keepdims=True))
    alpha = jnp.exp(m_prev - m_new)
    p = jnp.exp(s - m_new)                                               # f32
    l_ref[...] = alpha * l_ref[...] + jnp.sum(p, axis=-1, keepdims=True)
    acc_ref[...] = alpha * acc_ref[...] + jnp.dot(
        p.astype(bf16), proj_i, preferred_element_type=jnp.float32)
    m_ref[...] = m_new

    @pl.when(j == pl.num_programs(1) - 1)
    def _finalize():
        # Normalize AFTER the context matmul: one (tm, D) scale instead of a
        # (tm, N) `weights` temporary.  Exact divide (l >= 1 always).
        ctx_ref[...] = (acc_ref[...] / l_ref[...]).astype(ctx_ref.dtype)


# --------------------------------- wrapper ---------------------------------- #

@functools.partial(jax.jit, static_argnames=("tm", "tn"))
def attention_layer(w_in, w_out, inputs, outputs, *, tm=256, tn=256):
    """AttentionLayer forward.

    inputs : (N, d_in)     w_in : (d_in, d_out)  (pre-transposed Linear weight)
    outputs: (M, d_out)    w_out: (d_out, d_out) (pre-transposed Linear weight)
    Returns the context of shape (1, M, d_out)  (the torch unsqueeze(0)).
    """
    n, d_in = inputs.shape
    m, d_out = outputs.shape

    # Lane / MXU alignment: zero-pad feature dims to multiples of 128 (exact).
    d_in_p = _round_up(d_in, 128)
    d_p = _round_up(d_out, 128)
    inputs_p = _pad_to(inputs, 1, d_in_p)
    outputs_p = _pad_to(outputs, 1, d_p)
    w_in_p = _pad_to(_pad_to(w_in, 0, d_in_p), 1, d_p)
    w_out_p = _pad_to(_pad_to(w_out, 0, d_p), 1, d_p)

    # Sublane-aligned tile sizes and row padding.
    tm_eff = min(tm, _round_up(m, 8))
    tn_eff = min(tn, _round_up(n, 8))
    m_p = _round_up(m, tm_eff)
    n_p = _round_up(n, tn_eff)
    inputs_p = _pad_to(inputs_p, 0, n_p)     # padded N rows masked in-kernel
    outputs_p = _pad_to(outputs_p, 0, m_p)   # padded M rows sliced off below
    grid = (m_p // tm_eff, n_p // tn_eff)

    # Per-call VMEM budget from the actual footprint (blocks double-buffered),
    # floored at 32 MiB and capped at 64 MiB (safe on v5e/v6e/v7x).
    ib = inputs.dtype.itemsize
    footprint = 2 * ib * (tn_eff * d_in_p + d_in_p * d_p + tm_eff * d_p
                          + d_p * d_p + tm_eff * d_p)
    footprint += tm_eff * d_p * (2 + 4) + 2 * tm_eff * 4                # scratch
    vmem_limit = max(32 << 20, min(64 << 20, 2 * footprint + (4 << 20)))

    kernel = functools.partial(_attention_kernel, n_valid=n, tn=tn_eff)

    ctx_p = pl.pallas_call(
        kernel,
        out_shape=jax.ShapeDtypeStruct((m_p, d_p), inputs.dtype),
        grid=grid,
        in_specs=[
            pl.BlockSpec((tn_eff, d_in_p), lambda i, j: (j, 0)),   # inputs N-tile
            pl.BlockSpec((d_in_p, d_p), lambda i, j: (0, 0)),      # W_in  (resident)
            pl.BlockSpec((tm_eff, d_p), lambda i, j: (i, 0)),      # outputs M-tile
            pl.BlockSpec((d_p, d_p), lambda i, j: (0, 0)),         # W_out (resident)
        ],
        out_specs=pl.BlockSpec((tm_eff, d_p), lambda i, j: (i, 0)),
        scratch_shapes=[
            pltpu.VMEM((tm_eff, d_p), jnp.bfloat16),   # cached output projection
            pltpu.VMEM((tm_eff, 1), jnp.float32),      # running max
            pltpu.VMEM((tm_eff, 1), jnp.float32),      # running sum
            pltpu.VMEM((tm_eff, d_p), jnp.float32),    # context accumulator
        ],
        compiler_params=pltpu.CompilerParams(
            # M tiles are independent (megacore-parallel on v7x); the N axis is
            # the online-softmax reduction and must run serially per M tile.
            dimension_semantics=("parallel", "arbitrary"),
            vmem_limit_bytes=vmem_limit,
        ),
    )(inputs_p, w_in_p, outputs_p, w_out_p)

    return ctx_p[:m, :d_out][None]   # torch unsqueeze(0) -> (1, M, d_out)


# ------------------------------ init & references --------------------------- #

def init_params(key, input_size, output_size):
    """nn.Linear(bias=False) default init; weights stored pre-transposed."""
    k_wi, k_wo = jax.random.split(key)
    bi = 1.0 / math.sqrt(input_size)
    bo = 1.0 / math.sqrt(output_size)
    w_in = jax.random.uniform(k_wi, (input_size, output_size),
                              minval=-bi, maxval=bi, dtype=jnp.float32)
    w_out = jax.random.uniform(k_wo, (output_size, output_size),
                               minval=-bo, maxval=bo, dtype=jnp.float32)
    return w_in, w_out


def reference_f32(w_in, w_out, inputs, outputs):
    """Pure-f32 JAX reference for the same math."""
    proj_i = inputs @ w_in                        # (N, D)
    proj_o = outputs @ w_out                      # (M, D)
    scores = proj_i @ proj_o.T                    # (N, M)
    weights = jax.nn.softmax(scores, axis=0)      # softmax over N (torch dim=1)
    return (weights.T @ proj_i)[None]             # (1, M, D)


def reference_bf16(w_in, w_out, inputs, outputs):
    """Reference mirroring the kernel numerics (bf16 operands, f32 accumulate,
    post-matmul normalization)."""
    bf, f32 = jnp.bfloat16, jnp.float32
    proj_i = jnp.dot(inputs.astype(bf), w_in.astype(bf),
                     preferred_element_type=f32).astype(bf)
    proj_o = jnp.dot(outputs.astype(bf), w_out.astype(bf),
                     preferred_element_type=f32).astype(bf)
    s = jnp.dot(proj_o, proj_i.T, preferred_element_type=f32)      # (M, N)
    s = s - jnp.max(s, axis=-1, keepdims=True)
    e = jnp.exp(s)
    ctx = jnp.dot(e.astype(bf), proj_i, preferred_element_type=f32)
    ctx = ctx / jnp.sum(e, axis=-1, keepdims=True)
    return ctx[None]


# ---------------------------------- main ------------------------------------ #

if __name__ == "__main__":
    # Small demo shapes: d_in=64 exercises the feature-dim zero-pad path,
    # d_out=128 is lane-aligned.  tm=tn=128 forces a 2x2 grid so both the
    # parallel M axis and the online-softmax N reduction are exercised
    # (production default tiles are 256).
    N, M, D_IN, D_OUT = 256, 256, 64, 128

    root = jax.random.PRNGKey(0)
    k_p, k_in, k_out = jax.random.split(root, 3)
    w_in, w_out = init_params(k_p, D_IN, D_OUT)
    inputs = 0.5 * jax.random.normal(k_in, (N, D_IN), dtype=jnp.float32)
    outputs = 0.5 * jax.random.normal(k_out, (M, D_OUT), dtype=jnp.float32)

    ctx = attention_layer(w_in, w_out, inputs, outputs, tm=128, tn=128)
    ctx = jax.block_until_ready(ctx)
    assert ctx.shape == (1, M, D_OUT), ctx.shape

    ref16 = reference_bf16(w_in, w_out, inputs, outputs)
    ref32 = reference_f32(w_in, w_out, inputs, outputs)
    err16 = float(jnp.max(jnp.abs(ctx - ref16)))
    err32 = float(jnp.max(jnp.abs(ctx - ref32)))
    # Tight check vs. the numerics-matched (bf16-operand) reference; looser
    # check vs. the pure-f32 reference bounds the bf16 quantization error.
    assert jnp.allclose(ctx, ref16, atol=3e-2, rtol=3e-2), err16
    assert jnp.allclose(ctx, ref32, atol=1e-1, rtol=5e-2), err32

    print("KERNEL_OK")
</pallas_src>

<mosaic_0001>
module attributes {stable_mosaic.version = 11 : i64} {
  func.func @_attention_kernel(%arg0: i32, %arg1: i32, %arg2: memref<128x128xf32, #tpu.memory_space<vmem>>, %arg3: memref<128x128xf32, #tpu.memory_space<vmem>>, %arg4: memref<128x128xf32, #tpu.memory_space<vmem>>, %arg5: memref<128x128xf32, #tpu.memory_space<vmem>>, %arg6: memref<128x128xf32, #tpu.memory_space<vmem>>, %arg7: memref<128x128xbf16, #tpu.memory_space<vmem>>, %arg8: memref<128x1xf32, #tpu.memory_space<vmem>>, %arg9: memref<128x1xf32, #tpu.memory_space<vmem>>, %arg10: memref<128x128xf32, #tpu.memory_space<vmem>>) attributes {dimension_semantics = [#tpu.dimension_semantics<parallel>, #tpu.dimension_semantics<arbitrary>], iteration_bounds = array<i64: 2, 2>, scalar_prefetch = 0 : i64, scratch_operands = 4 : i64, tpu.core_type = #tpu.core_type<tc>, window_params = [{transform_indices = @transform_0, window_bounds = array<i64: 128, 128>}, {pipeline_mode = #tpu.pipeline_mode<synchronous>, transform_indices = @transform_1, window_bounds = array<i64: 128, 128>}, {transform_indices = @transform_2, window_bounds = array<i64: 128, 128>}, {pipeline_mode = #tpu.pipeline_mode<synchronous>, transform_indices = @transform_3, window_bounds = array<i64: 128, 128>}, {transform_indices = @transform_4, window_bounds = array<i64: 128, 128>}]} {
    %c0_i32 = arith.constant 0 : i32
    %0 = arith.cmpi eq, %arg1, %c0_i32 : i32
    %1 = arith.extui %0 : i1 to i32
    %c0_i32_0 = arith.constant 0 : i32
    %2 = arith.cmpi ne, %1, %c0_i32_0 : i32
    scf.if %2 {
      %c0_23 = arith.constant 0 : index
      %c0_24 = arith.constant 0 : index
      %37 = vector.load %arg4[%c0_23, %c0_24] : memref<128x128xf32, #tpu.memory_space<vmem>>, vector<128x128xf32>
      %38 = arith.truncf %37 : vector<128x128xf32> to vector<128x128xbf16>
      %c0_25 = arith.constant 0 : index
      %c0_26 = arith.constant 0 : index
      %39 = vector.load %arg5[%c0_25, %c0_26] : memref<128x128xf32, #tpu.memory_space<vmem>>, vector<128x128xf32>
      %40 = arith.truncf %39 : vector<128x128xf32> to vector<128x128xbf16>
      %cst_27 = arith.constant dense<0.000000e+00> : vector<128x128xf32>
      %41 = tpu.matmul %38, %40, %cst_27 {dimension_numbers = #tpu.dot_dimension_numbers<[1], [0], [0], [1], [0, 0, 1, 1], [], []>} : vector<128x128xbf16>, vector<128x128xbf16>, vector<128x128xf32> -> vector<128x128xf32>
      %42 = arith.truncf %41 : vector<128x128xf32> to vector<128x128xbf16>
      %c0_28 = arith.constant 0 : index
      %c0_29 = arith.constant 0 : index
      %43 = vector.load %arg7[%c0_28, %c0_29] : memref<128x128xbf16, #tpu.memory_space<vmem>>, vector<128x128xbf16>
      tpu.vector_store %arg7[%c0_28, %c0_29], %42 {strides = array<i32>} : memref<128x128xbf16, #tpu.memory_space<vmem>>, vector<128x128xbf16>,
      %cst_30 = arith.constant 0xFF800000 : f32
      %44 = vector.broadcast %cst_30 : f32 to vector<128x1xf32>
      %c0_31 = arith.constant 0 : index
      %c0_32 = arith.constant 0 : index
      %45 = vector.load %arg8[%c0_31, %c0_32] : memref<128x1xf32, #tpu.memory_space<vmem>>, vector<128x1xf32>
      tpu.vector_store %arg8[%c0_31, %c0_32], %44 {strides = array<i32>} : memref<128x1xf32, #tpu.memory_space<vmem>>, vector<128x1xf32>,
      %cst_33 = arith.constant 0.000000e+00 : f32
      %46 = vector.broadcast %cst_33 : f32 to vector<128x1xf32>
      %c0_34 = arith.constant 0 : index
      %c0_35 = arith.constant 0 : index
      %47 = vector.load %arg9[%c0_34, %c0_35] : memref<128x1xf32, #tpu.memory_space<vmem>>, vector<128x1xf32>
      tpu.vector_store %arg9[%c0_34, %c0_35], %46 {strides = array<i32>} : memref<128x1xf32, #tpu.memory_space<vmem>>, vector<128x1xf32>,
      %cst_36 = arith.constant 0.000000e+00 : f32
      %48 = vector.broadcast %cst_36 : f32 to vector<128x128xf32>
      %c0_37 = arith.constant 0 : index
      %c0_38 = arith.constant 0 : index
      %49 = vector.load %arg10[%c0_37, %c0_38] : memref<128x128xf32, #tpu.memory_space<vmem>>, vector<128x128xf32>
      tpu.vector_store %arg10[%c0_37, %c0_38], %48 {strides = array<i32>} : memref<128x128xf32, #tpu.memory_space<vmem>>, vector<128x128xf32>,
    } else {
    }
    %c0 = arith.constant 0 : index
    %c0_1 = arith.constant 0 : index
    %3 = vector.load %arg2[%c0, %c0_1] : memref<128x128xf32, #tpu.memory_space<vmem>>, vector<128x128xf32>
    %4 = arith.truncf %3 : vector<128x128xf32> to vector<128x128xbf16>
    %c0_2 = arith.constant 0 : index
    %c0_3 = arith.constant 0 : index
    %5 = vector.load %arg3[%c0_2, %c0_3] : memref<128x128xf32, #tpu.memory_space<vmem>>, vector<128x128xf32>
    %6 = arith.truncf %5 : vector<128x128xf32> to vector<128x128xbf16>
    %cst = arith.constant dense<0.000000e+00> : vector<128x128xf32>
    %7 = tpu.matmul %4, %6, %cst {dimension_numbers = #tpu.dot_dimension_numbers<[1], [0], [0], [1], [0, 0, 1, 1], [], []>} : vector<128x128xbf16>, vector<128x128xbf16>, vector<128x128xf32> -> vector<128x128xf32>
    %8 = arith.truncf %7 : vector<128x128xf32> to vector<128x128xbf16>
    %c0_4 = arith.constant 0 : index
    %c0_5 = arith.constant 0 : index
    %9 = vector.load %arg7[%c0_4, %c0_5] : memref<128x128xbf16, #tpu.memory_space<vmem>>, vector<128x128xbf16>
    %cst_6 = arith.constant dense<0.000000e+00> : vector<128x128xf32>
    %10 = tpu.matmul %9, %8, %cst_6 {dimension_numbers = #tpu.dot_dimension_numbers<[1], [1], [0], [0], [0, 0, 1, 0], [], []>} : vector<128x128xbf16>, vector<128x128xbf16>, vector<128x128xf32> -> vector<128x128xf32>
    %c0_7 = arith.constant 0 : index
    %c0_8 = arith.constant 0 : index
    %11 = vector.load %arg8[%c0_7, %c0_8] : memref<128x1xf32, #tpu.memory_space<vmem>>, vector<128x1xf32>
    %cst_9 = arith.constant dense<0xFF800000> : vector<128xf32>
    %12 = vector.multi_reduction <maximumf>, %10, %cst_9 [1] : vector<128x128xf32> to vector<128xf32>
    %13 = vector.shape_cast %12 : vector<128xf32> to vector<128x1xf32>
    %14 = arith.maximumf %11, %13 : vector<128x1xf32>
    %15 = arith.subf %11, %14 : vector<128x1xf32>
    %16 = math.exp %15 : vector<128x1xf32>
    %17 = vector.broadcast %14 : vector<128x1xf32> to vector<128x128xf32>
    %18 = arith.subf %10, %17 : vector<128x128xf32>
    %19 = math.exp %18 : vector<128x128xf32>
    %c0_10 = arith.constant 0 : index
    %c0_11 = arith.constant 0 : index
    %20 = vector.load %arg9[%c0_10, %c0_11] : memref<128x1xf32, #tpu.memory_space<vmem>>, vector<128x1xf32>
    %21 = arith.mulf %16, %20 : vector<128x1xf32>
    %cst_12 = arith.constant dense<0.000000e+00> : vector<128xf32>
    %22 = vector.multi_reduction <add>, %19, %cst_12 [1] : vector<128x128xf32> to vector<128xf32>
    %23 = vector.shape_cast %22 : vector<128xf32> to vector<128x1xf32>
    %24 = arith.addf %21, %23 : vector<128x1xf32>
    %c0_13 = arith.constant 0 : index
    %c0_14 = arith.constant 0 : index
    %25 = vector.load %arg9[%c0_13, %c0_14] : memref<128x1xf32, #tpu.memory_space<vmem>>, vector<128x1xf32>
    tpu.vector_store %arg9[%c0_13, %c0_14], %24 {strides = array<i32>} : memref<128x1xf32, #tpu.memory_space<vmem>>, vector<128x1xf32>,
    %c0_15 = arith.constant 0 : index
    %c0_16 = arith.constant 0 : index
    %26 = vector.load %arg10[%c0_15, %c0_16] : memref<128x128xf32, #tpu.memory_space<vmem>>, vector<128x128xf32>
    %27 = vector.broadcast %16 : vector<128x1xf32> to vector<128x128xf32>
    %28 = arith.mulf %27, %26 : vector<128x128xf32>
    %29 = arith.truncf %19 : vector<128x128xf32> to vector<128x128xbf16>
    %cst_17 = arith.constant dense<0.000000e+00> : vector<128x128xf32>
    %30 = tpu.matmul %29, %8, %cst_17 {dimension_numbers = #tpu.dot_dimension_numbers<[1], [0], [0], [1], [0, 0, 1, 1], [], []>} : vector<128x128xbf16>, vector<128x128xbf16>, vector<128x128xf32> -> vector<128x128xf32>
    %31 = arith.addf %28, %30 : vector<128x128xf32>
    %c0_18 = arith.constant 0 : index
    %c0_19 = arith.constant 0 : index
    %32 = vector.load %arg10[%c0_18, %c0_19] : memref<128x128xf32, #tpu.memory_space<vmem>>, vector<128x128xf32>
    tpu.vector_store %arg10[%c0_18, %c0_19], %31 {strides = array<i32>} : memref<128x128xf32, #tpu.memory_space<vmem>>, vector<128x128xf32>,
    %c0_20 = arith.constant 0 : index
    %c0_21 = arith.constant 0 : index
    %33 = vector.load %arg8[%c0_20, %c0_21] : memref<128x1xf32, #tpu.memory_space<vmem>>, vector<128x1xf32>
    tpu.vector_store %arg8[%c0_20, %c0_21], %14 {strides = array<i32>} : memref<128x1xf32, #tpu.memory_space<vmem>>, vector<128x1xf32>,
    %c1_i32 = arith.constant 1 : i32
    %34 = arith.cmpi eq, %arg1, %c1_i32 : i32
    %35 = arith.extui %34 : i1 to i32
    %c0_i32_22 = arith.constant 0 : i32
    %36 = arith.cmpi ne, %35, %c0_i32_22 : i32
    scf.if %36 {
      %c0_23 = arith.constant 0 : index
      %c0_24 = arith.constant 0 : index
      %37 = vector.load %arg10[%c0_23, %c0_24] : memref<128x128xf32, #tpu.memory_space<vmem>>, vector<128x128xf32>
      %c0_25 = arith.constant 0 : index
      %c0_26 = arith.constant 0 : index
      %38 = vector.load %arg9[%c0_25, %c0_26] : memref<128x1xf32, #tpu.memory_space<vmem>>, vector<128x1xf32>
      %39 = vector.broadcast %38 : vector<128x1xf32> to vector<128x128xf32>
      %40 = arith.divf %37, %39 : vector<128x128xf32>
      %c0_27 = arith.constant 0 : index
      %c0_28 = arith.constant 0 : index
      %41 = vector.load %arg6[%c0_27, %c0_28] : memref<128x128xf32, #tpu.memory_space<vmem>>, vector<128x128xf32>
      tpu.vector_store %arg6[%c0_27, %c0_28], %40 {strides = array<i32>} : memref<128x128xf32, #tpu.memory_space<vmem>>, vector<128x128xf32>,
    } else {
    }
    return
  }
  func.func @transform_0(%arg0: i32, %arg1: i32) -> (i32, i32) {
    %c0_i32 = arith.constant 0 : i32
    %c0_i32_0 = arith.constant 0 : i32
    return %arg1, %c0_i32 : i32, i32
  }
  func.func @transform_1(%arg0: i32, %arg1: i32) -> (i32, i32) {
    %c0_i32 = arith.constant 0 : i32
    %c0_i32_0 = arith.constant 0 : i32
    %c0_i32_1 = arith.constant 0 : i32
    return %c0_i32, %c0_i32_0 : i32, i32
  }
  func.func @transform_2(%arg0: i32, %arg1: i32) -> (i32, i32) {
    %c0_i32 = arith.constant 0 : i32
    %c0_i32_0 = arith.constant 0 : i32
    return %arg0, %c0_i32 : i32, i32
  }
  func.func @transform_3(%arg0: i32, %arg1: i32) -> (i32, i32) {
    %c0_i32 = arith.constant 0 : i32
    %c0_i32_0 = arith.constant 0 : i32
    %c0_i32_1 = arith.constant 0 : i32
    return %c0_i32, %c0_i32_0 : i32, i32
  }
  func.func @transform_4(%arg0: i32, %arg1: i32) -> (i32, i32) {
    %c0_i32 = arith.constant 0 : i32
    %c0_i32_0 = arith.constant 0 : i32
    return %arg0, %c0_i32 : i32, i32
  }
}

</mosaic_0001>

<bundles_post_ra>
// kernel: attention_layer.1
= control target key start
LH: loop header
LB: loop body
LE: loop exit
PB: predicated region body
PF: predicated region fallthrough
CT: control target
= control target key end

     0   :  { %9 = vsyncpa [#allocation7], 0  ;;  %s2744_s0 = inlined_call_operand.vmem [shape: f32[256,128], index: 0, kind: input, shape index: {}]   ;;  %s2745_s1 = inlined_call_operand.vmem [shape: f32[128,128], index: 1, kind: input, shape index: {}]   ;;  %s2746_s2 = inlined_call_operand.vmem [shape: f32[256,128], index: 2, kind: input, shape index: {}]   ;;  %s2747_s3 = inlined_call_operand.vmem [shape: f32[128,128], index: 3, kind: input, shape index: {}]   ;;  %s2748_s4 = inlined_call_operand.hbm [shape: f32[256,128], index: 4, kind: output, shape index: {}]  }
   0x1   :  { %11 = vsyncpa [#allocation7 + $0x1], 0  ;;  %s2102_s15 = smov 0   ;;  %s2104_s16 = smov 0  }
   0x2   :  { %s2106_s17 = smov 0   ;;  %s2108_s18 = smov 0  }
   0x3   :  { %s2110_s19 = smov 0   ;;  %s2112_s20 = smov 0  }
   0x4   :  { %s2114_s21 = smov 0   ;;  %s2116_s22 = smov 0  }
   0x5 LB: > { %s1571_s23 = sadd.s32 4294967295, %s2068_s22   ;;  %s1572_s24 = sadd.s32 4294967294, %s2068_s22   ;;  %s2068_s22 = sphi %s2116_s22, %s17_s22   ;;  %s2064_s21 = sphi %s2114_s21, %s2762_s21   ;;  %s2060_s20 = sphi %s2112_s20, %s2761_s20   ;;  %s2056_s19 = sphi %s2110_s19, %s2760_s19   ;;  %s2052_s18 = sphi %s2108_s18, %s2759_s18   ;;  %s2048_s17 = sphi %s2106_s17, %s2758_s17   ;;  %s2044_s16 = sphi %s2104_s16, %s2757_s16   ;;  %s2040_s15 = sphi %s2102_s15, %s2756_s15  }
   0x6   : > { %s26_s25 = sadd.s32 1, %s2060_s20  ;;  %s29_s26 = sadd.s32 1, %s2064_s21 }
   0x7   : > { %p27_p0 = scmp.ge.s32.totalorder %s26_s25, 2  ;;  %p140_p1 = scmp.ne.s32.totalorder %s2048_s17, %s2044_s16 }
   0x8   : > { %p141_p2 = scmp.eq.s32.totalorder %s1571_s23, 3  ;;  %p146_p4 = scmp.ne.s32.totalorder %s2044_s16, %s2040_s15 }
   0x9   : > { %s2764_s25 = smov (%p27_p0, %s26_s25), 0  ;;  %s2766_s26 = smov (!%p27_p0, %s29_s26), %s2064_s21 }
   0xa   : > { %p2151_p3 = por %p141_p2, %p140_p1  ;;  %p31_p5 = scmp.ge.s32.totalorder %s2766_s26, 2 }
   0xb   : > { %p147_p6 = scmp.eq.s32.totalorder %s1572_s24, 3  ;;  %p1575_p7 = scmp.ge.s32.totalorder %s2068_s22, 1 }
   0xc   : > { %p189_p8 = scmp.lt.s32.totalorder %s2068_s22, 5  ;;  %s2768_s26 = smov (%p31_p5, %s2766_s26), 0 }
   0xd   : > { %2752 = sst [smem:[#allocation9_spill]] %s2768_s26  ;;  %p2161_p9 = por %p147_p6, %p146_p4 }
   0xe   : > { %p190_p10 = pnand %p1575_p7, %p189_p8  ;;  %s127_s29 = ssub.s32 %s2064_s21, %s2768_s26 }
   0xf   : > { %s130_s30 = sadd.s32 1, %s2048_s17  ;;  %p128_p11 = scmp.eq.s32.totalorder %s127_s29, 0 }
  0x10   : > { %193 = sbr.rel (%p190_p10) target bundleno = 1523 (0x5f3), region = 36  ;;  %s2749_s6 = sand.u32 (!%p190_p10), 1, %s2044_s16  }
  0x11   : > { %s2169_s5 = scalar_select %p128_p11, %s2048_s17, %s130_s30  }
  0x12   : > { %s1577_s7 = sshll.u32 (!%p190_p10), %s2052_s18, 4  ;;  %s1576_s8 = sshll.u32 (!%p190_p10), %s2749_s6, 7 }
  0x13   : > { %p221_p12 = scmp.lt.s32.totalorder (!%p190_p10), %s1577_s7, 31  ;;  %s1579_s9 = sshll.u32 (!%p190_p10), %s2056_s19, 4 }
  0x14   : > { %p227_p13 = scmp.lt.s32.totalorder (!%p190_p10), %s1579_s9, 31  ;;  %s2186_s30 = scalar_lea.vmem (!%p190_p10), [#allocation6], %s1576_s8 }
  0x15   : > { %p1581_p0 = scmp.ne.s32.totalorder (!%p190_p10), %s2052_s18, 0 }
  0x17   : > { %s2770_s7 = smov (!%p221_p12, %s1577_s7), 31  ;;  %s2772_s9 = smov (!%p227_p13, %s1579_s9), 31 }
  0x18   : > { %s1578_s10 = sshll.u32 %s2770_s7, 3  ;;  %s1580_s14 = sshll.u32 %s2772_s9, 3  ;;  %v262_v0 = vld [vmem:[%s2747_s3] sm:$0xff] (!%p1581_p0)  ;;  %v263_v1 = vld [vmem:[%s2747_s3 + $0x8] sm:$0xff] (!%p1581_p0)  ;;  %v264_v2 = vld [vmem:[%s2747_s3 + $0x10] sm:$0xff] (!%p1581_p0)  ;;  %vm399_vm0 = vcmask (!%p1581_p0), 7168  }
  0x19   : > { %s2179_s13 = scalar_lea.vmem %s2744_s0, %s1578_s10  ;;  %s2184_s29 = scalar_lea.vmem %s2746_s2, %s1580_s14  ;;  %v278_v3 = vpack.c.bf16 (!%p1581_p0), %v263_v1, %v262_v0  ;;  %v265_v4 = vld [vmem:[%s2747_s3 + $0x18] sm:$0xff] (!%p1581_p0)  ;;  %v266_v6 = vld [vmem:[%s2747_s3 + $0x20] sm:$0xff] (!%p1581_p0)  ;;  %v267_v7 = vld [vmem:[%s2747_s3 + $0x28] sm:$0xff] (!%p1581_p0)  ;;  %v2070_v48 = vmov (!%p1581_p0), -inf   ;;  %v2071_v49 = vmov (!%p1581_p0), 0.0  }
  0x1a   : > { %237 = sbr.rel (%p1581_p0) target bundleno = 285 (0x11d), region = 40  ;;  %v279_v5 = vpack.c.bf16 (!%p1581_p0), %v265_v4, %v264_v2  ;;  %v280_v8 = vpack.c.bf16 (!%p1581_p0), %v267_v7, %v266_v6  ;;  %v268_v9 = vld [vmem:[%s2747_s3 + $0x30] sm:$0xff] (!%p1581_p0)  ;;  %v238_v10 = vld [vmem:[%s2184_s29] sm:$0xff] (!%p1581_p0)  ;;  %v239_v11 = vld [vmem:[%s2184_s29 + $0x8] sm:$0xff] (!%p1581_p0)  ;;  %400 = vst.msk [vmem:[#allocation3] sm:$0xff] (!%p1581_p0), %vm399_vm0, %v2070_v48 }
  0x1b   : > { %1653 = vmatprep.subr.bf16.mxu0 (!%p1581_p0), %v278_v3  ;;  %1781 = vmatprep.subr.bf16.mxu1 (!%p1581_p0), %v278_v3  ;;  %v269_v12 = vld [vmem:[%s2747_s3 + $0x38] sm:$0xff] (!%p1581_p0)  ;;  %v254_v13 = vpack.c.bf16 (!%p1581_p0), %v239_v11, %v238_v10  ;;  %v246_v14 = vld [vmem:[%s2184_s29 + $0x40] sm:$0xff] (!%p1581_p0)  ;;  %v247_v15 = vld [vmem:[%s2184_s29 + $0x48] sm:$0xff] (!%p1581_p0)  ;;  %401 = vst.msk [vmem:[#allocation3 + $0x8] sm:$0xff] (!%p1581_p0), %vm399_vm0, %v2070_v48 }
  0x1c   : > { %1654 = vmatpush3.bf16.msra.mxu0 (!%p1581_p0), %v278_v3  ;;  %1789 = vmatpush3.bf16.msra.mxu1 (!%p1581_p0), %v278_v3  ;;  %v258_v16 = vpack.c.bf16 (!%p1581_p0), %v247_v15, %v246_v14  ;;  %v281_v17 = vpack.c.bf16 (!%p1581_p0), %v269_v12, %v268_v9  ;;  %v270_v18 = vld [vmem:[%s2747_s3 + $0x40] sm:$0xff] (!%p1581_p0)  ;;  %v271_v19 = vld [vmem:[%s2747_s3 + $0x48] sm:$0xff] (!%p1581_p0)  ;;  %v272_v21 = vld [vmem:[%s2747_s3 + $0x50] sm:$0xff] (!%p1581_p0)  ;;  %402 = vst.msk [vmem:[#allocation3 + $0x10] sm:$0xff] (!%p1581_p0), %vm399_vm0, %v2070_v48 }
  0x1d   : > { %1655 = vmatprep.subr.bf16.mxu0 (!%p1581_p0), %v279_v5  ;;  %1782 = vmatprep.subr.bf16.mxu1 (!%p1581_p0), %v279_v5  ;;  %v282_v20 = vpack.c.bf16 (!%p1581_p0), %v271_v19, %v270_v18  ;;  %v273_v22 = vld [vmem:[%s2747_s3 + $0x58] sm:$0xff] (!%p1581_p0)  ;;  %v274_v24 = vld [vmem:[%s2747_s3 + $0x60] sm:$0xff] (!%p1581_p0)  ;;  %v275_v25 = vld [vmem:[%s2747_s3 + $0x68] sm:$0xff] (!%p1581_p0)  ;;  %403 = vst.msk [vmem:[#allocation3 + $0x18] sm:$0xff] (!%p1581_p0), %vm399_vm0, %v2070_v48 }
  0x1e   : > { %1669 = vmatprep.mubr.bf16.mxu0 (!%p1581_p0), %v254_v13  ;;  %1677 = vmatprep.mubr.bf16.mxu1 (!%p1581_p0), %v258_v16  ;;  %v283_v23 = vpack.c.bf16 (!%p1581_p0), %v273_v22, %v272_v21  ;;  %v284_v26 = vpack.c.bf16 (!%p1581_p0), %v275_v25, %v274_v24  ;;  %v276_v27 = vld [vmem:[%s2747_s3 + $0x70] sm:$0xff] (!%p1581_p0)  ;;  %v277_v28 = vld [vmem:[%s2747_s3 + $0x78] sm:$0xff] (!%p1581_p0)  ;;  %v242_v34 = vld [vmem:[%s2184_s29 + $0x20] sm:$0xff] (!%p1581_p0)  ;;  %404 = vst.msk [vmem:[#allocation3 + $0x20] sm:$0xff] (!%p1581_p0), %vm399_vm0, %v2070_v48 }
  0x1f   : > { %v285_v29 = vpack.c.bf16 (!%p1581_p0), %v277_v28, %v276_v27  ;;  %v240_v30 = vld [vmem:[%s2184_s29 + $0x10] sm:$0xff] (!%p1581_p0)  ;;  %v241_v31 = vld [vmem:[%s2184_s29 + $0x18] sm:$0xff] (!%p1581_p0)  ;;  %v243_v35 = vld [vmem:[%s2184_s29 + $0x28] sm:$0xff] (!%p1581_p0)  ;;  %405 = vst.msk [vmem:[#allocation3 + $0x28] sm:$0xff] (!%p1581_p0), %vm399_vm0, %v2070_v48 }
  0x20   : > { %1656 = vmatpush3.bf16.msra.mxu0 (!%p1581_p0), %v279_v5  ;;  %1790 = vmatpush3.bf16.msra.mxu1 (!%p1581_p0), %v279_v5  ;;  %v248_v32 = vld [vmem:[%s2184_s29 + $0x50] sm:$0xff] (!%p1581_p0)  ;;  %v249_v33 = vld [vmem:[%s2184_s29 + $0x58] sm:$0xff] (!%p1581_p0)  ;;  %v250_v36 = vld [vmem:[%s2184_s29 + $0x60] sm:$0xff] (!%p1581_p0)  ;;  %v255_v38 = vpack.c.bf16 (!%p1581_p0), %v241_v31, %v240_v30  ;;  %v256_v40 = vpack.c.bf16 (!%p1581_p0), %v243_v35, %v242_v34  ;;  %406 = vst.msk [vmem:[#allocation3 + $0x30] sm:$0xff] (!%p1581_p0), %vm399_vm0, %v2070_v48 }
  0x21   : > { %1657 = vmatprep.subr.bf16.mxu0 %v280_v8  ;;  %1783 = vmatprep.subr.bf16.mxu1 %v280_v8  ;;  %v251_v37 = vld [vmem:[%s2184_s29 + $0x68] sm:$0xff]  ;;  %v259_v39 = vpack.c.bf16 %v249_v33, %v248_v32  ;;  %v244_v42 = vld [vmem:[%s2184_s29 + $0x30] sm:$0xff]  ;;  %v245_v43 = vld [vmem:[%s2184_s29 + $0x38] sm:$0xff]  ;;  %407 = vst.msk [vmem:[#allocation3 + $0x38] sm:$0xff] %vm399_vm0, %v2070_v48 }
  0x22   : > { %v260_v41 = vpack.c.bf16 %v251_v37, %v250_v36  ;;  %v252_v44 = vld [vmem:[%s2184_s29 + $0x70] sm:$0xff]  ;;  %v253_v45 = vld [vmem:[%s2184_s29 + $0x78] sm:$0xff]  ;;  %v257_v46 = vpack.c.bf16 %v245_v43, %v244_v42  ;;  %408 = vst.msk [vmem:[#allocation3 + $0x40] sm:$0xff] %vm399_vm0, %v2070_v48  ;;  %409 = vst.msk [vmem:[#allocation3 + $0x48] sm:$0xff] %vm399_vm0, %v2070_v48 }
  0x23   : > { %v261_v47 = vpack.c.bf16 %v253_v45, %v252_v44  ;;  %410 = vst.msk [vmem:[#allocation3 + $0x50] sm:$0xff] %vm399_vm0, %v2070_v48  ;;  %411 = vst.msk [vmem:[#allocation3 + $0x58] sm:$0xff] %vm399_vm0, %v2070_v48 }
  0x24   : > { %1658 = vmatpush3.bf16.msra.mxu0 %v280_v8  ;;  %1791 = vmatpush3.bf16.msra.mxu1 %v280_v8  ;;  %412 = vst.msk [vmem:[#allocation3 + $0x60] sm:$0xff] %vm399_vm0, %v2070_v48  ;;  %413 = vst.msk [vmem:[#allocation3 + $0x68] sm:$0xff] %vm399_vm0, %v2070_v48 }
  0x25   : > { %1659 = vmatprep.subr.bf16.mxu0 %v281_v17  ;;  %1784 = vmatprep.subr.bf16.mxu1 %v281_v17  ;;  %414 = vst.msk [vmem:[#allocation3 + $0x70] sm:$0xff] %vm399_vm0, %v2070_v48  ;;  %415 = vst.msk [vmem:[#allocation3 + $0x78] sm:$0xff] %vm399_vm0, %v2070_v48 }
  0x26   : > { %416 = vst.msk [vmem:[#allocation4] sm:$0xff] %vm399_vm0, %v2071_v49  ;;  %417 = vst.msk [vmem:[#allocation4 + $0x8] sm:$0xff] %vm399_vm0, %v2071_v49 }
  0x27   : > { %418 = vst.msk [vmem:[#allocation4 + $0x10] sm:$0xff] %vm399_vm0, %v2071_v49  ;;  %419 = vst.msk [vmem:[#allocation4 + $0x18] sm:$0xff] %vm399_vm0, %v2071_v49 }
  0x28   : > { %1660 = vmatpush3.bf16.msra.mxu0 %v281_v17  ;;  %1792 = vmatpush3.bf16.msra.mxu1 %v281_v17  ;;  %420 = vst.msk [vmem:[#allocation4 + $0x20] sm:$0xff] %vm399_vm0, %v2071_v49  ;;  %421 = vst.msk [vmem:[#allocation4 + $0x28] sm:$0xff] %vm399_vm0, %v2071_v49 }
  0x29   : > { %1661 = vmatprep.subr.bf16.mxu0 %v282_v20  ;;  %1785 = vmatprep.subr.bf16.mxu1 %v282_v20  ;;  %422 = vst.msk [vmem:[#allocation4 + $0x30] sm:$0xff] %vm399_vm0, %v2071_v49  ;;  %423 = vst.msk [vmem:[#allocation4 + $0x38] sm:$0xff] %vm399_vm0, %v2071_v49 }
  0x2a   : > { %424 = vst.msk [vmem:[#allocation4 + $0x40] sm:$0xff] %vm399_vm0, %v2071_v49  ;;  %425 = vst.msk [vmem:[#allocation4 + $0x48] sm:$0xff] %vm399_vm0, %v2071_v49 }
  0x2b   : > { %426 = vst.msk [vmem:[#allocation4 + $0x50] sm:$0xff] %vm399_vm0, %v2071_v49  ;;  %427 = vst.msk [vmem:[#allocation4 + $0x58] sm:$0xff] %vm399_vm0, %v2071_v49 }
  0x2c   : > { %1662 = vmatpush3.bf16.msra.mxu0 %v282_v20  ;;  %1793 = vmatpush3.bf16.msra.mxu1 %v282_v20  ;;  %428 = vst.msk [vmem:[#allocation4 + $0x60] sm:$0xff] %vm399_vm0, %v2071_v49  ;;  %429 = vst.msk [vmem:[#allocation4 + $0x68] sm:$0xff] %vm399_vm0, %v2071_v49 }
  0x2d   : > { %1663 = vmatprep.subr.bf16.mxu0 %v283_v23  ;;  %1786 = vmatprep.subr.bf16.mxu1 %v283_v23  ;;  %430 = vst.msk [vmem:[#allocation4 + $0x70] sm:$0xff] %vm399_vm0, %v2071_v49  ;;  %431 = vst.msk [vmem:[#allocation4 + $0x78] sm:$0xff] %vm399_vm0, %v2071_v49 }
  0x2e   : > { %432 = vst [vmem:[#allocation5] sm:$0xff] %v2071_v49  ;;  %433 = vst [vmem:[#allocation5 + $0x8] sm:$0xff] %v2071_v49 }
  0x2f   : > { %434 = vst [vmem:[#allocation5 + $0x10] sm:$0xff] %v2071_v49  ;;  %435 = vst [vmem:[#allocation5 + $0x18] sm:$0xff] %v2071_v49 }
  0x30   : > { %1664 = vmatpush3.bf16.msra.mxu0 %v283_v23  ;;  %1794 = vmatpush3.bf16.msra.mxu1 %v283_v23  ;;  %436 = vst [vmem:[#allocation5 + $0x20] sm:$0xff] %v2071_v49  ;;  %437 = vst [vmem:[#allocation5 + $0x28] sm:$0xff] %v2071_v49 }
  0x31   : > { %1665 = vmatprep.subr.bf16.mxu0 %v284_v26  ;;  %1787 = vmatprep.subr.bf16.mxu1 %v284_v26  ;;  %438 = vst [vmem:[#allocation5 + $0x30] sm:$0xff] %v2071_v49  ;;  %439 = vst [vmem:[#allocation5 + $0x38] sm:$0xff] %v2071_v49 }
  0x32   : > { %440 = vst [vmem:[#allocation5 + $0x40] sm:$0xff] %v2071_v49  ;;  %441 = vst [vmem:[#allocation5 + $0x48] sm:$0xff] %v2071_v49 }
  0x33   : > { %442 = vst [vmem:[#allocation5 + $0x50] sm:$0xff] %v2071_v49  ;;  %443 = vst [vmem:[#allocation5 + $0x58] sm:$0xff] %v2071_v49 }
  0x34   : > { %1666 = vmatpush3.bf16.msra.mxu0 %v284_v26  ;;  %1795 = vmatpush3.bf16.msra.mxu1 %v284_v26  ;;  %444 = vst [vmem:[#allocation5 + $0x60] sm:$0xff] %v2071_v49  ;;  %445 = vst [vmem:[#allocation5 + $0x68] sm:$0xff] %v2071_v49 }
  0x35   : > { %1667 = vmatprep.subr.bf16.mxu0 %v285_v29  ;;  %1788 = vmatprep.subr.bf16.mxu1 %v285_v29  ;;  %446 = vst [vmem:[#allocation5 + $0x70] sm:$0xff] %v2071_v49  ;;  %447 = vst [vmem:[#allocation5 + $0x78] sm:$0xff] %v2071_v49 }
  0x38   : > { %1668 = vmatpush3.bf16.msra.mxu0 %v285_v29  ;;  %1796 = vmatpush3.bf16.msra.mxu1 %v285_v29 }
  0x3b   : > { %1670 = vmatmul.mubr.bf16.vlgmr.msra.gmra.mrb[0].mxu0 %v255_v38  ;;  %1678 = vmatmul.mubr.bf16.vlgmr.msra.gmra.mrb[0].mxu1 %v259_v39 }
  0x3c   : > { %1673 = vmatprep.mubr.bf16.mxu0 %v256_v40  ;;  %1681 = vmatprep.mubr.bf16.mxu1 %v260_v41 }
  0x43   : > { %1674 = vmatmul.mubr.bf16.gmra.mrb[4].mxu0 %v257_v46  ;;  %1682 = vmatmul.mubr.bf16.gmra.mrb[4].mxu1 %v261_v47 }
 0x10e   : > { %v1671_v50 = vpop.f32.mrb[0].mxu0  ;;  %v1679_v51 = vpop.f32.mrb[0].mxu1 }
 0x10f   : > { %v320_v52 = vpop.f32.mrb[1].mxu0  ;;  %v352_v53 = vpop.f32.mrb[1].mxu1 }
 0x110   : > { %v1672_v54 = vpop.f32.mrb[2].mxu0  ;;  %v1680_v55 = vpop.f32.mrb[2].mxu1 }
 0x111   : > { %v384_v56 = vpack.c.bf16 %v1672_v54, %v1671_v50  ;;  %v388_v57 = vpack.c.bf16 %v1680_v55, %v1679_v51  ;;  %v323_v58 = vpop.f32.mrb[3].mxu0  ;;  %v355_v59 = vpop.f32.mrb[3].mxu1 }
 0x112   : > { %v383_v60 = vpack.c.bf16 %v323_v58, %v320_v52  ;;  %v387_v61 = vpack.c.bf16 %v355_v59, %v352_v53 }
 0x113   : > { %392 = vst [vmem:[#allocation2 + $0x8] sm:$0xff] %v384_v56  ;;  %396 = vst [vmem:[#allocation2 + $0x28] sm:$0xff] %v388_v57 }
 0x114   : > { %391 = vst [vmem:[#allocation2] sm:$0xff] %v383_v60  ;;  %395 = vst [vmem:[#allocation2 + $0x20] sm:$0xff] %v387_v61 }
 0x116   : > { %v1675_v62 = vpop.f32.mrb[4].mxu0  ;;  %v1683_v63 = vpop.f32.mrb[4].mxu1 }
 0x117   : > { %v336_v0 = vpop.f32.mrb[5].mxu0  ;;  %v368_v1 = vpop.f32.mrb[5].mxu1 }
 0x118   : > { %v1676_v2 = vpop.f32.mrb[6].mxu0  ;;  %v1684_v3 = vpop.f32.mrb[6].mxu1 }
 0x119   : > { %v386_v4 = vpack.c.bf16 %v1676_v2, %v1675_v62  ;;  %v390_v5 = vpack.c.bf16 %v1684_v3, %v1683_v63  ;;  %v339_v6 = vpop.f32.mrb[7].mxu0  ;;  %v371_v7 = vpop.f32.mrb[7].mxu1 }
 0x11a   : > { %v385_v8 = vpack.c.bf16 %v339_v6, %v336_v0  ;;  %v389_v9 = vpack.c.bf16 %v371_v7, %v368_v1 }
 0x11b   : > { %394 = vst [vmem:[#allocation2 + $0x18] sm:$0xff] %v386_v4  ;;  %398 = vst [vmem:[#allocation2 + $0x38] sm:$0xff] %v390_v5 }
 0x11c   : > { %393 = vst [vmem:[#allocation2 + $0x10] sm:$0xff] %v385_v8  ;;  %397 = vst [vmem:[#allocation2 + $0x30] sm:$0xff] %v389_v9 }
 0x11d PF: > { %v472_v10 = vld [vmem:[%s2745_s1] sm:$0xff]  ;;  %v473_v11 = vld [vmem:[%s2745_s1 + $0x8] sm:$0xff]  ;;  %v474_v12 = vld [vmem:[%s2745_s1 + $0x10] sm:$0xff]  ;;  %vm1026_vm1 = vcmask 7168   ;;  %p1582_p1 = scmp.ne.s32.totalorder %s2052_s18, 1 }
 0x11e   : > { %v488_v13 = vpack.c.bf16 %v473_v11, %v472_v10  ;;  %v475_v14 = vld [vmem:[%s2745_s1 + $0x18] sm:$0xff]  ;;  %v476_v16 = vld [vmem:[%s2745_s1 + $0x20] sm:$0xff]  ;;  %v477_v17 = vld [vmem:[%s2745_s1 + $0x28] sm:$0xff] }
 0x11f   : > { %v489_v15 = vpack.c.bf16 %v475_v14, %v474_v12  ;;  %v490_v18 = vpack.c.bf16 %v477_v17, %v476_v16  ;;  %v448_v19 = vld [vmem:[%s2179_s13] sm:$0xff]  ;;  %v449_v20 = vld [vmem:[%s2179_s13 + $0x8] sm:$0xff]  ;;  %v478_v21 = vld [vmem:[%s2745_s1 + $0x30] sm:$0xff] }
 0x120   : > { %1685 = vmatprep.subr.bf16.mxu0 %v488_v13  ;;  %v479_v22 = vld [vmem:[%s2745_s1 + $0x38] sm:$0xff]  ;;  %v464_v23 = vpack.c.bf16 %v449_v20, %v448_v19  ;;  %v480_v25 = vld [vmem:[%s2745_s1 + $0x40] sm:$0xff]  ;;  %v481_v26 = vld [vmem:[%s2745_s1 + $0x48] sm:$0xff] }
 0x121   : > { %1686 = vmatpush3.bf16.msra.mxu0 %v488_v13  ;;  %v491_v24 = vpack.c.bf16 %v479_v22, %v478_v21  ;;  %v492_v27 = vpack.c.bf16 %v481_v26, %v480_v25  ;;  %v482_v28 = vld [vmem:[%s2745_s1 + $0x50] sm:$0xff]  ;;  %v483_v29 = vld [vmem:[%s2745_s1 + $0x58] sm:$0xff]  ;;  %v484_v31 = vld [vmem:[%s2745_s1 + $0x60] sm:$0xff] }
 0x122   : > { %1687 = vmatprep.subr.bf16.mxu0 %v489_v15  ;;  %1701 = vmatprep.mubr.bf16.mxu0 %v464_v23  ;;  %v493_v30 = vpack.c.bf16 %v483_v29, %v482_v28  ;;  %v485_v32 = vld [vmem:[%s2745_s1 + $0x68] sm:$0xff]  ;;  %v486_v34 = vld [vmem:[%s2745_s1 + $0x70] sm:$0xff]  ;;  %v487_v35 = vld [vmem:[%s2745_s1 + $0x78] sm:$0xff] }
 0x123   : > { %v494_v33 = vpack.c.bf16 %v485_v32, %v484_v31  ;;  %v495_v36 = vpack.c.bf16 %v487_v35, %v486_v34  ;;  %v450_v37 = vld [vmem:[%s2179_s13 + $0x10] sm:$0xff]  ;;  %v451_v38 = vld [vmem:[%s2179_s13 + $0x18] sm:$0xff]  ;;  %v452_v39 = vld [vmem:[%s2179_s13 + $0x20] sm:$0xff]  ;;  %v2072_v35 = vmov 0  }
 0x124   : > { %v453_v40 = vld [vmem:[%s2179_s13 + $0x28] sm:$0xff]  ;;  %v465_v41 = vpack.c.bf16 %v451_v38, %v450_v37  ;;  %v454_v43 = vld [vmem:[%s2179_s13 + $0x30] sm:$0xff]  ;;  %v455_v44 = vld [vmem:[%s2179_s13 + $0x38] sm:$0xff]  ;;  %1875 = vset.pattern.permute.xlu1 %v2072_v35  ;;  %1874 = vset.pattern.permute.xlu0 %v2072_v35 }
 0x125   : > { %1688 = vmatpush3.bf16.msra.mxu0 %v489_v15  ;;  %v466_v42 = vpack.c.bf16 %v453_v40, %v452_v39  ;;  %v456_v45 = vld [vmem:[%s2179_s13 + $0x40] sm:$0xff]  ;;  %v457_v46 = vld [vmem:[%s2179_s13 + $0x48] sm:$0xff]  ;;  %v467_v47 = vpack.c.bf16 %v455_v44, %v454_v43  ;;  %v458_v49 = vld [vmem:[%s2179_s13 + $0x50] sm:$0xff] }
 0x126   : > { %1689 = vmatprep.subr.bf16.mxu0 %v490_v18  ;;  %v468_v48 = vpack.c.bf16 %v457_v46, %v456_v45  ;;  %v459_v50 = vld [vmem:[%s2179_s13 + $0x58] sm:$0xff]  ;;  %v460_v51 = vld [vmem:[%s2179_s13 + $0x60] sm:$0xff]  ;;  %v461_v52 = vld [vmem:[%s2179_s13 + $0x68] sm:$0xff] }
 0x127   : > { %v469_v53 = vpack.c.bf16 %v459_v50, %v458_v49  ;;  %v470_v54 = vpack.c.bf16 %v461_v52, %v460_v51  ;;  %v462_v55 = vld [vmem:[%s2179_s13 + $0x70] sm:$0xff]  ;;  %v463_v56 = vld [vmem:[%s2179_s13 + $0x78] sm:$0xff]  ;;  %v601_v58 = vld [vmem:[#allocation2] sm:$0xff] }
 0x128   : > { %v471_v57 = vpack.c.bf16 %v463_v56, %v462_v55  ;;  %1733 = vmatprep.mubr.bf16.mxu1 %v601_v58  ;;  %v602_v19 = vld [vmem:[#allocation2 + $0x8] sm:$0xff]  ;;  %v603_v20 = vld [vmem:[#allocation2 + $0x10] sm:$0xff]  ;;  %v604_v21 = vld [vmem:[#allocation2 + $0x18] sm:$0xff] }
 0x129   : > { %1690 = vmatpush3.bf16.msra.mxu0 %v490_v18  ;;  %v605_v22 = vld [vmem:[#allocation2 + $0x20] sm:$0xff]  ;;  %v606_v23 = vld [vmem:[#allocation2 + $0x28] sm:$0xff]  ;;  %v608_v25 = vld [vmem:[#allocation2 + $0x38] sm:$0xff] }
 0x12a   : > { %1691 = vmatprep.subr.bf16.mxu0 %v491_v24  ;;  %v2397_v43 = vld [vmem:[#allocation3 + $0x10] sm:$0xff]  ;;  %v706_v44 = vld [vmem:[#allocation3] sm:$0xff]  ;;  %v2402_v49 = vld [vmem:[#allocation3 + $0x18] sm:$0xff] }
 0x12b   : > { %v2407_v50 = vld [vmem:[#allocation3 + $0x8] sm:$0xff]  ;;  %v2415_v55 = vld [vmem:[#allocation3 + $0x20] sm:$0xff]  ;;  %v2419_v56 = vld [vmem:[#allocation3 + $0x38] sm:$0xff] }
 0x12d   : > { %1692 = vmatpush3.bf16.msra.mxu0 %v491_v24  ;;  %v607_v24 = vld [vmem:[#allocation2 + $0x30] sm:$0xff] }
 0x12e   : > { %1693 = vmatprep.subr.bf16.mxu0 %v492_v27 }
 0x131   : > { %1694 = vmatpush3.bf16.msra.mxu0 %v492_v27 }
 0x132   : > { %1695 = vmatprep.subr.bf16.mxu0 %v493_v30 }
 0x135   : > { %1696 = vmatpush3.bf16.msra.mxu0 %v493_v30 }
 0x136   : > { %1697 = vmatprep.subr.bf16.mxu0 %v494_v33 }
 0x139   : > { %1698 = vmatpush3.bf16.msra.mxu0 %v494_v33 }
 0x13a   : > { %1699 = vmatprep.subr.bf16.mxu0 %v495_v36 }
 0x13d   : > { %1700 = vmatpush3.bf16.msra.mxu0 %v495_v36 }
 0x140   : > { %1702 = vmatmul.mubr.bf16.vlgmr.msra.gmra.mrb[0].mxu0 %v465_v41 }
 0x141   : > { %1705 = vmatprep.mubr.bf16.mxu0 %v466_v42 }
 0x148   : > { %1706 = vmatmul.mubr.bf16.gmra.mrb[4].mxu0 %v467_v47 }
 0x149   : > { %1709 = vmatprep.mubr.bf16.mxu0 %v468_v48 }
 0x150   : > { %1710 = vmatmul.mubr.bf16.gmra.mrb[8].mxu0 %v469_v53 }
 0x151   : > { %1713 = vmatprep.mubr.bf16.mxu0 %v470_v54 }
 0x158   : > { %1714 = vmatmul.mubr.bf16.gmra.mrb[12].mxu0 %v471_v57 }
 0x213   : > { %v1703_v59 = vpop.f32.mrb[0].mxu0 }
 0x214   : > { %v530_v60 = vpop.f32.mrb[1].mxu0 }
 0x215   : > { %v1704_v61 = vpop.f32.mrb[2].mxu0 }
 0x216   : > { %v594_v62 = vpack.c.bf16 %v1704_v61, %v1703_v59  ;;  %v533_v63 = vpop.f32.mrb[3].mxu0  ;;  %v2428_v61 = vld [vmem:[#allocation3 + $0x30] sm:$0xff] }
 0x217   : > { %v593_v0 = vpack.c.bf16 %v533_v63, %v530_v60 }
 0x219   : > { %1717 = vmatprep.subr.bf16.mxu1 %v593_v0  ;;  %1749 = vmatprep.subr.bf16.mxu0 %v593_v0 }
 0x21a   : > { %1718 = vmatpush3.bf16.xpose.msra.mxu1 %v593_v0  ;;  %1750 = vmatpush3.bf16.msra.mxu0 %v593_v0 }
 0x21b   : > { %v1707_v1 = vpop.f32.mrb[4].mxu0  ;;  %1719 = vmatprep.subr.bf16.mxu1 %v594_v62  ;;  %1751 = vmatprep.subr.bf16.mxu0 %v594_v62 }
 0x21c   : > { %v546_v2 = vpop.f32.mrb[5].mxu0 }
 0x21d   : > { %v1708_v3 = vpop.f32.mrb[6].mxu0 }
 0x21e   : > { %v596_v4 = vpack.c.bf16 %v1708_v3, %v1707_v1  ;;  %v549_v5 = vpop.f32.mrb[7].mxu0  ;;  %1752 = vmatpush3.bf16.msra.mxu0 %v594_v62  ;;  %v2437_v3 = vld [vmem:[#allocation3 + $0x40] sm:$0xff] }
 0x21f   : > { %v595_v6 = vpack.c.bf16 %v549_v5, %v546_v2 }
 0x221   : > { %1753 = vmatprep.subr.bf16.mxu0 %v595_v6 }
 0x222   : > { %1720 = vmatpush3.bf16.xpose.msra.mxu1 %v594_v62  ;;  %1754 = vmatpush3.bf16.msra.mxu0 %v595_v6  ;;  %v711_v62 = vld [vmem:[#allocation3 + $0x28] sm:$0xff] }
 0x223   : > { %1755 = vmatprep.subr.bf16.mxu0 %v596_v4  ;;  %1721 = vmatprep.subr.bf16.mxu1 %v595_v6  ;;  %v1711_v7 = vpop.f32.mrb[8].mxu0 }
 0x224   : > { %v562_v8 = vpop.f32.mrb[9].mxu0 }
 0x225   : > { %v1712_v9 = vpop.f32.mrb[10].mxu0 }
 0x226   : > { %1756 = vmatpush3.bf16.msra.mxu0 %v596_v4  ;;  %v598_v10 = vpack.c.bf16 %v1712_v9, %v1711_v7  ;;  %v565_v11 = vpop.f32.mrb[11].mxu0  ;;  %v2451_v9 = vld [vmem:[#allocation3 + $0x50] sm:$0xff] }
 0x227   : > { %v597_v12 = vpack.c.bf16 %v565_v11, %v562_v8 }
 0x229   : > { %1757 = vmatprep.subr.bf16.mxu0 %v597_v12 }
 0x22a   : > { %1722 = vmatpush3.bf16.xpose.msra.mxu1 %v595_v6  ;;  %1758 = vmatpush3.bf16.msra.mxu0 %v597_v12 }
 0x22b   : > { %1723 = vmatprep.subr.bf16.mxu1 %v596_v4  ;;  %1759 = vmatprep.subr.bf16.mxu0 %v598_v10  ;;  %v1715_v13 = vpop.f32.mrb[12].mxu0 }
 0x22c   : > { %v578_v14 = vpop.f32.mrb[13].mxu0 }
 0x22d   : > { %v1716_v15 = vpop.f32.mrb[14].mxu0 }
 0x22e   : > { %1760 = vmatpush3.bf16.msra.mxu0 %v598_v10  ;;  %v600_v16 = vpack.c.bf16 %v1716_v15, %v1715_v13  ;;  %v581_v17 = vpop.f32.mrb[15].mxu0 }
 0x22f   : > { %v599_v18 = vpack.c.bf16 %v581_v17, %v578_v14  ;;  %v2468_v17 = vld [vmem:[#allocation3 + $0x78] sm:$0xff] }
 0x231   : > { %1761 = vmatprep.subr.bf16.mxu0 %v599_v18 }
 0x232   : > { %1724 = vmatpush3.bf16.xpose.msra.mxu1 %v596_v4  ;;  %1762 = vmatpush3.bf16.msra.mxu0 %v599_v18  ;;  %v2442_v4 = vld [vmem:[#allocation3 + $0x58] sm:$0xff] }
 0x233   : > { %1725 = vmatprep.subr.bf16.mxu1 %v597_v12  ;;  %1763 = vmatprep.subr.bf16.mxu0 %v600_v16 }
 0x236   : > { %1764 = vmatpush3.bf16.msra.mxu0 %v600_v16 }
 0x23a   : > { %1726 = vmatpush3.bf16.xpose.msra.mxu1 %v597_v12 }
 0x23b   : > { %1727 = vmatprep.subr.bf16.mxu1 %v598_v10 }
 0x242   : > { %1728 = vmatpush3.bf16.xpose.msra.mxu1 %v598_v10  ;;  %v2456_v10 = vld [vmem:[#allocation3 + $0x48] sm:$0xff] }
 0x243   : > { %1729 = vmatprep.subr.bf16.mxu1 %v599_v18 }
 0x24a   : > { %1730 = vmatpush3.bf16.xpose.msra.mxu1 %v599_v18 }
 0x24b   : > { %1731 = vmatprep.subr.bf16.mxu1 %v600_v16 }
 0x252   : > { %1732 = vmatpush3.bf16.xpose.msra.mxu1 %v600_v16  ;;  %v2464_v16 = vld [vmem:[#allocation3 + $0x60] sm:$0xff] }
 0x259   : > { %1734 = vmatmul.mubr.bf16.vlgmr.msra.gmra.mrb[0].mxu1 %v602_v19 }
 0x25a   : > { %1737 = vmatprep.mubr.bf16.mxu1 %v603_v20 }
 0x261   : > { %1738 = vmatmul.mubr.bf16.gmra.mrb[4].mxu1 %v604_v21 }
 0x262   : > { %1741 = vmatprep.mubr.bf16.mxu1 %v605_v22 }
 0x269   : > { %1742 = vmatmul.mubr.bf16.gmra.mrb[8].mxu1 %v606_v23 }
 0x26a   : > { %1745 = vmatprep.mubr.bf16.mxu1 %v607_v24  ;;  %v2478_v24 = vld [vmem:[#allocation3 + $0x70] sm:$0xff] }
 0x271   : > { %1746 = vmatmul.mubr.bf16.gmra.mrb[12].mxu1 %v608_v25  ;;  %v719_v25 = vld [vmem:[#allocation3 + $0x68] sm:$0xff] }
 0x32c   : > { %v2349_v26 = vpop.f32.mrb[0].mxu1 }
 0x32d   : > { %726 = vmax.xlane.f32.xlu1 %v2349_v26  ;;  %v2352_v27 = vpop.f32.mrb[1].mxu1 }
 0x32e   : > { %722 = vmax.xlane.f32.xlu0 %v2352_v27  ;;  %v2355_v28 = vpop.f32.mrb[2].mxu1 }
 0x32f   : > { %v2357_v29 = vpop.f32.mrb[3].mxu1 }
 0x331   : > { %728 = vmax.xlane.f32.xlu1 %v2355_v28 }
 0x332   : > { %724 = vmax.xlane.f32.xlu0 %v2357_v29 }
 0x334   : > { %v2361_v30 = vpop.f32.mrb[4].mxu1 }
 0x335   : > { %v2363_v31 = vpop.f32.mrb[5].mxu1 }
 0x336   : > { %730 = vmax.xlane.f32.xlu0 %v2363_v31  ;;  %v2366_v32 = vpop.f32.mrb[6].mxu1 }
 0x337   : > { %736 = vmax.xlane.f32.xlu1 %v2366_v32  ;;  %v2369_v33 = vpop.f32.mrb[7].mxu1 }
 0x33a   : > { %734 = vmax.xlane.f32.xlu0 %v2361_v30 }
 0x33b   : > { %732 = vmax.xlane.f32.xlu1 %v2369_v33 }
 0x33c   : > { %v2373_v34 = vpop.f32.mrb[8].mxu1 }
 0x33d   : > { %v2375_v36 = vpop.f32.mrb[9].mxu1 }
 0x33e   : > { %v2377_v37 = vpop.f32.mrb[10].mxu1  ;;  %738 = vmax.xlane.f32.xlu0 %v2375_v36 }
 0x33f   : > { %744 = vmax.xlane.f32.xlu1 %v2377_v37  ;;  %v2381_v38 = vpop.f32.mrb[11].mxu1 }
 0x342   : > { %742 = vmax.xlane.f32.xlu0 %v2373_v34 }
 0x343   : > { %740 = vmax.xlane.f32.xlu1 %v2381_v38 }
 0x344   : > { %v2385_v39 = vpop.f32.mrb[12].mxu1 }
 0x345   : > { %v2387_v40 = vpop.f32.mrb[13].mxu1 }
 0x346   : > { %v2389_v41 = vpop.f32.mrb[14].mxu1  ;;  %746 = vmax.xlane.f32.xlu0 %v2387_v40 }
 0x347   : > { %752 = vmax.xlane.f32.xlu1 %v2389_v41  ;;  %v2393_v42 = vpop.f32.mrb[15].mxu1 }
 0x34a   : > { %750 = vmax.xlane.f32.xlu0 %v2385_v39 }
 0x34b   : > { %748 = vmax.xlane.f32.xlu1 %v2393_v42 }
 0x3ba   : > { %v727_v45 = vpop.xlane.xlu1 %726 }
 0x3bb   : > { %v2400_v46 = vmax.f32 %v2397_v43, %v727_v45  ;;  %v723_v47 = vpop.xlane.xlu0 %722 }
 0x3bc   : > { %v754_v48 = vmax.f32 %v706_v44, %v723_v47 }
 0x3bd   : > { %1294 = vst.msk [vmem:[#allocation3 + $0x10] sm:$0xff] %vm1026_vm1, %v2400_v46  ;;  %830 = vperm.xlu1 %1875, %v2400_v46  }
 0x3be   : > { %1292 = vst.msk [vmem:[#allocation3] sm:$0xff] %vm1026_vm1, %v754_v48  ;;  %v729_v51 = vpop.xlane.xlu1 %728  ;;  %820 = vperm.xlu0 %1874, %v754_v48   ;;  %v770_v12 = vsub.f32 %v706_v44, %v754_v48 }
 0x3bf   : > { %v757_v52 = vmax.f32 %v2402_v49, %v729_v51  ;;  %v725_v53 = vpop.xlane.xlu0 %724 }
 0x3c0   : > { %v2412_v54 = vmax.f32 %v2407_v50, %v725_v53  ;;  %v786_v19 = vmul.f32 1.442695, %v770_v12  ;;  %v772_v53 = vsub.f32 %v2397_v43, %v2400_v46 }
 0x3c1   : > { %1295 = vst.msk [vmem:[#allocation3 + $0x18] sm:$0xff] %vm1026_vm1, %v757_v52  ;;  %835 = vperm.xlu1 %1875, %v757_v52   ;;  %v773_v20 = vsub.f32 %v2402_v49, %v757_v52 }
 0x3c2   : > { %1293 = vst.msk [vmem:[#allocation3 + $0x8] sm:$0xff] %vm1026_vm1, %v2412_v54  ;;  %v771_v35 = vsub.f32 %v2407_v50, %v2412_v54  ;;  %1876 = vpow2.f32 %v786_v19 }
 0x3c3   : > { %v731_v57 = vpop.xlane.xlu0 %730  ;;  %v792_v47 = vmul.f32 1.442695, %v773_v20 }
 0x3c4   : > { %v2422_v58 = vmax.f32 %v2415_v55, %v731_v57  ;;  %v737_v59 = vpop.xlane.xlu1 %736 }
 0x3c5   : > { %v2425_v60 = vmax.f32 %v2419_v56, %v737_v59  ;;  %825 = vperm.xlu1 %1875, %v2412_v54   ;;  %v788_v54 = vmul.f32 1.442695, %v771_v35  ;;  %1878 = vpow2.f32 %v792_v47 }
 0x3c6   : > { %1296 = vst.msk [vmem:[#allocation3 + $0x20] sm:$0xff] %vm1026_vm1, %v2422_v58 }
 0x3c7   : > { %1299 = vst.msk [vmem:[#allocation3 + $0x38] sm:$0xff] %vm1026_vm1, %v2425_v60  ;;  %v735_v63 = vpop.xlane.xlu0 %734  ;;  %v777_v57 = vsub.f32 %v2419_v56, %v2425_v60  ;;  %1880 = vpow2.f32 %v788_v54 }
 0x3c8   : > { %v2435_v0 = vmax.f32 %v2428_v61, %v735_v63  ;;  %v733_v1 = vpop.xlane.xlu1 %732  ;;  %v774_v63 = vsub.f32 %v2415_v55, %v2422_v58 }
 0x3c9   : > { %v759_v2 = vmax.f32 %v711_v62, %v733_v1  ;;  %v800_v1 = vmul.f32 1.442695, %v777_v57 }
 0x3ca   : > { %1298 = vst.msk [vmem:[#allocation3 + $0x30] sm:$0xff] %vm1026_vm1, %v2435_v0  ;;  %850 = vperm.xlu1 %1875, %v2435_v0   ;;  %v794_v56 = vmul.f32 1.442695, %v774_v63 }
 0x3cb   : > { %1297 = vst.msk [vmem:[#allocation3 + $0x28] sm:$0xff] %vm1026_vm1, %v759_v2  ;;  %v739_v5 = vpop.xlane.xlu0 %738  ;;  %v775_v48 = vsub.f32 %v711_v62, %v759_v2  ;;  %v790_v62 = vmul.f32 1.442695, %v772_v53 }
 0x3cc   : > { %v745_v6 = vpop.xlane.xlu1 %744  ;;  %v2446_v7 = vmax.f32 %v2437_v3, %v739_v5  ;;  %v2509_v46 = vpop.eup %1876 }
 0x3cd   : > { %v2449_v8 = vmax.f32 %v2442_v4, %v745_v6  ;;  %v796_v59 = vmul.f32 1.442695, %v775_v48 }
 0x3ce   : > { %1300 = vst.msk [vmem:[#allocation3 + $0x40] sm:$0xff] %vm1026_vm1, %v2446_v7  ;;  %840 = vperm.xlu1 %1875, %v2422_v58  }
 0x3cf   : > { %1303 = vst.msk [vmem:[#allocation3 + $0x58] sm:$0xff] %vm1026_vm1, %v2449_v8  ;;  %v743_v11 = vpop.xlane.xlu0 %742  ;;  %1882 = vpow2.f32 %v796_v59  ;;  %v781_v43 = vsub.f32 %v2442_v4, %v2449_v8 }
 0x3d0   : > { %v741_v13 = vpop.xlane.xlu1 %740  ;;  %v2461_v14 = vmax.f32 %v2451_v9, %v743_v11  ;;  %1884 = vpow2.f32 %v790_v62 }
 0x3d1   : > { %v763_v15 = vmax.f32 %v2456_v10, %v741_v13  ;;  %1886 = vpow2.f32 %v800_v1  ;;  %v808_v55 = vmul.f32 1.442695, %v781_v43 }
 0x3d2   : > { %1302 = vst.msk [vmem:[#allocation3 + $0x50] sm:$0xff] %vm1026_vm1, %v2461_v14  ;;  %845 = vperm.xlu1 %1875, %v759_v2   ;;  %v2516_v2 = vpop.eup %1878  ;;  %1888 = vpow2.f32 %v794_v56  ;;  %v780_v5 = vsub.f32 %v2451_v9, %v2461_v14 }
 0x3d3   : > { %1301 = vst.msk [vmem:[#allocation3 + $0x48] sm:$0xff] %vm1026_vm1, %v763_v15  ;;  %865 = vperm.xlu0 %1874, %v763_v15   ;;  %v747_v18 = vpop.xlane.xlu0 %746  ;;  %v779_v58 = vsub.f32 %v2456_v10, %v763_v15  ;;  %1890 = vpow2.f32 %v808_v55  ;;  %v778_v10 = vsub.f32 %v2437_v3, %v2446_v7 }
 0x3d4   : > { %v753_v21 = vpop.xlane.xlu1 %752  ;;  %v2473_v22 = vmax.f32 %v2464_v16, %v747_v18  ;;  %v806_v11 = vmul.f32 1.442695, %v780_v5 }
 0x3d5   : > { %v2476_v23 = vmax.f32 %v2468_v17, %v753_v21  ;;  %v804_v6 = vmul.f32 1.442695, %v779_v58 }
 0x3d6   : > { %1304 = vst.msk [vmem:[#allocation3 + $0x60] sm:$0xff] %vm1026_vm1, %v2473_v22  ;;  %855 = vperm.xlu1 %1875, %v2425_v60   ;;  %v776_v60 = vsub.f32 %v2428_v61, %v2435_v0  ;;  %v2522_v0 = vpop.eup %1880  ;;  %v782_v15 = vsub.f32 %v2464_v16, %v2473_v22 }
 0x3d7   : > { %v785_v44 = vsub.f32 %v2468_v17, %v2476_v23  ;;  %1307 = vst.msk [vmem:[#allocation3 + $0x78] sm:$0xff] %vm1026_vm1, %v2476_v23  ;;  %875 = vperm.xlu0 %1874, %v2449_v8   ;;  %v751_v45 = vpop.xlane.xlu0 %750 }
 0x3d8   : > { %v749_v49 = vpop.xlane.xlu1 %748  ;;  %v2491_v51 = vmax.f32 %v2478_v24, %v751_v45  ;;  %v798_v4 = vmul.f32 1.442695, %v776_v60  ;;  %v810_v18 = vmul.f32 1.442695, %v782_v15 }
 0x3d9   : > { %v767_v52 = vmax.f32 %v719_v25, %v749_v49  ;;  %v2524_v8 = vpop.eup %1882 }
 0x3da   : > { %v784_v50 = vsub.f32 %v2478_v24, %v2491_v51  ;;  %1306 = vst.msk [vmem:[#allocation3 + $0x70] sm:$0xff] %vm1026_vm1, %v2491_v51  ;;  %860 = vperm.xlu1 %1875, %v2446_v7   ;;  %1892 = vpow2.f32 %v798_v4  ;;  %v2530_v12 = vpop.eup %1884 }
 0x3db   : > { %1305 = vst.msk [vmem:[#allocation3 + $0x68] sm:$0xff] %vm1026_vm1, %v767_v52  ;;  %885 = vperm.xlu0 %1874, %v767_v52   ;;  %v783_v61 = vsub.f32 %v719_v25, %v767_v52  ;;  %1894 = vpow2.f32 %v804_v6  ;;  %v2532_v13 = vpop.eup %1886 }
 0x3dc   : > { %1896 = vpow2.f32 %v806_v11  ;;  %v2538_v3 = vpop.eup %1888 }
 0x3dd   : > { %v812_v9 = vmul.f32 1.442695, %v783_v61  ;;  %v2540_v7 = vpop.eup %1890 }
 0x3de   : > { %870 = vperm.xlu1 %1875, %v2461_v14   ;;  %v802_v14 = vmul.f32 1.442695, %v778_v10 }
 0x3df   : > { %895 = vperm.xlu0 %1874, %v2476_v23   ;;  %1898 = vpow2.f32 %v812_v9 }
 0x3e0   : > { %1900 = vpow2.f32 %v802_v14 }
 0x3e1   : > { %1902 = vpow2.f32 %v810_v18 }
 0x3e2   : > { %880 = vperm.xlu1 %1875, %v2473_v22  }
 0x3e3   : > { %1061 = vperm.xlu0 %1874, %v2509_v46  }
 0x3e4   : > { %v2544_v19 = vpop.eup %1892 }
 0x3e5   : > { %v2546_v20 = vpop.eup %1894 }
 0x3e6   : > { %890 = vperm.xlu1 %1875, %v2491_v51   ;;  %v2550_v16 = vpop.eup %1896 }
 0x3e7   : > { %1076 = vperm.xlu0 %1874, %v2516_v2  }
 0x3e9   : > { %v2552_v21 = vpop.eup %1898 }
 0x3ea   : > { %1066 = vperm.xlu1 %1875, %v2522_v0   ;;  %v2556_v22 = vpop.eup %1900 }
 0x3eb   : > { %1086 = vperm.xlu0 %1874, %v2524_v8   ;;  %v2559_v25 = vpop.eup %1902 }
 0x3ee   : > { %1071 = vperm.xlu1 %1875, %v2530_v12  }
 0x3ef   : > { %1096 = vperm.xlu0 %1874, %v2532_v13  }
 0x3f2   : > { %1081 = vperm.xlu1 %1875, %v2538_v3  }
 0x3f3   : > { %1116 = vperm.xlu0 %1874, %v2540_v7  }
 0x3f6   : > { %1091 = vperm.xlu1 %1875, %v2544_v19  }
 0x3f7   : > { %1106 = vperm.xlu0 %1874, %v2546_v20  }
 0x3fa   : > { %1111 = vperm.xlu1 %1875, %v2550_v16  }
 0x3fb   : > { %1126 = vperm.xlu0 %1874, %v2552_v21  }
 0x3fe   : > { %1101 = vperm.xlu1 %1875, %v2556_v22  }
 0x402   : > { %1121 = vperm.xlu1 %1875, %v2559_v25  }
 0x43c   : > { %v831_v35 = vpop.permute.xlu1 %830 }
 0x43d   : > { %v900_v45 = vsub.f32 %v2349_v26, %v831_v35  ;;  %v821_v47 = vpop.permute.xlu0 %820 }
 0x43e   : > { %v898_v48 = vsub.f32 %v2352_v27, %v821_v47 }
 0x43f   : > { %v918_v49 = vmul.f32 1.442695, %v900_v45 }
 0x440   : > { %v914_v52 = vmul.f32 1.442695, %v898_v48  ;;  %v836_v53 = vpop.permute.xlu1 %835 }
 0x441   : > { %1904 = vpow2.f32 %v918_v49  ;;  %v901_v54 = vsub.f32 %v2355_v28, %v836_v53 }
 0x442   : > { %1906 = vpow2.f32 %v914_v52 }
 0x443   : > { %v920_v57 = vmul.f32 1.442695, %v901_v54 }
 0x444   : > { %v826_v59 = vpop.permute.xlu1 %825 }
 0x445   : > { %1908 = vpow2.f32 %v920_v57  ;;  %v899_v62 = vsub.f32 %v2357_v29, %v826_v59 }
 0x447   : > { %v916_v63 = vmul.f32 1.442695, %v899_v62 }
 0x449   : > { %1910 = vpow2.f32 %v916_v63  ;;  %v851_v1 = vpop.permute.xlu1 %850 }
 0x44a   : > { %v904_v26 = vsub.f32 %v2361_v30, %v851_v1 }
 0x44b   : > { %v1905_v43 = vpop.eup %1904 }
 0x44c   : > { %v1907_v56 = vpop.eup %1906  ;;  %v926_v27 = vmul.f32 1.442695, %v904_v26  ;;  %982 = vadd.xlane.f32.xlu0 %v1905_v43 }
 0x44d   : > { %978 = vadd.xlane.f32.xlu1 %v1907_v56  ;;  %v841_v60 = vpop.permute.xlu1 %840 }
 0x44e   : > { %1912 = vpow2.f32 %v926_v27  ;;  %v902_v28 = vsub.f32 %v2363_v31, %v841_v60 }
 0x44f   : > { %v1909_v55 = vpop.eup %1908 }
 0x450   : > { %v922_v58 = vmul.f32 1.442695, %v902_v28  ;;  %v1156_v4 = vpack.c.bf16 %v1909_v55, %v1905_v43 }
 0x451   : > { %984 = vadd.xlane.f32.xlu1 %v1909_v55  ;;  %v846_v5 = vpop.permute.xlu1 %845 }
 0x452   : > { %1914 = vpow2.f32 %v922_v58  ;;  %v903_v29 = vsub.f32 %v2369_v33, %v846_v5  ;;  %v866_v6 = vpop.permute.xlu0 %865 }
 0x453   : > { %v1911_v61 = vpop.eup %1910  ;;  %v907_v11 = vsub.f32 %v2381_v38, %v866_v6 }
 0x454   : > { %v924_v30 = vmul.f32 1.442695, %v903_v29  ;;  %980 = vadd.xlane.f32.xlu0 %v1911_v61  ;;  %v1155_v10 = vpack.c.bf16 %v1911_v61, %v1907_v56 }
 0x455   : > { %v856_v9 = vpop.permute.xlu1 %855  ;;  %v932_v35 = vmul.f32 1.442695, %v907_v11  ;;  %v814_v11 = vmul.f32 1.442695, %v784_v50 }
 0x456   : > { %1916 = vpow2.f32 %v924_v30  ;;  %v905_v14 = vsub.f32 %v2366_v32, %v856_v9  ;;  %v876_v31 = vpop.permute.xlu0 %875  ;;  %1765 = vmatprep.mubr.bf16.mxu0 %v1155_v10  ;;  %v816_v9 = vmul.f32 1.442695, %v785_v44 }
 0x457   : > { %1766 = vmatmul.mubr.bf16.vlgmr.msra.gmra.mrb[16].mxu0 %v1156_v4  ;;  %v909_v45 = vsub.f32 %v2377_v37, %v876_v31 }
 0x458   : > { %v1913_v15 = vpop.eup %1912  ;;  %v928_v18 = vmul.f32 1.442695, %v905_v14 }
 0x459   : > { %990 = vadd.xlane.f32.xlu0 %v1913_v15  ;;  %v861_v33 = vpop.permute.xlu1 %860  ;;  %v936_v52 = vmul.f32 1.442695, %v909_v45 }
 0x45a   : > { %1918 = vpow2.f32 %v928_v18  ;;  %v906_v47 = vsub.f32 %v2375_v36, %v861_v33  ;;  %v886_v48 = vpop.permute.xlu0 %885 }
 0x45b   : > { %1920 = vpow2.f32 %v932_v35  ;;  %v911_v32 = vsub.f32 %v2393_v42, %v886_v48 }
 0x45c   : > { %v1915_v49 = vpop.eup %1914  ;;  %v930_v38 = vmul.f32 1.442695, %v906_v47 }
 0x45d   : > { %986 = vadd.xlane.f32.xlu0 %v1915_v49  ;;  %v871_v53 = vpop.permute.xlu1 %870  ;;  %v940_v62 = vmul.f32 1.442695, %v911_v32 }
 0x45e   : > { %1922 = vpow2.f32 %v930_v38  ;;  %v908_v54 = vsub.f32 %v2373_v34, %v871_v53  ;;  %v896_v57 = vpop.permute.xlu0 %895 }
 0x45f   : > { %1924 = vpow2.f32 %v936_v52  ;;  %v913_v63 = vsub.f32 %v2389_v41, %v896_v57  ;;  %v946_v52 = vld [vmem:[#allocation4] sm:$0xff] }
 0x460   : > { %v1917_v59 = vpop.eup %1916  ;;  %v934_v37 = vmul.f32 1.442695, %v908_v54  ;;  %v962_v54 = vmul.f32 %v2509_v46, %v946_v52  ;;  %v952_v46 = vld [vmem:[#allocation4 + $0x30] sm:$0xff] }
 0x461   : > { %v881_v36 = vpop.permute.xlu1 %880  ;;  %v1157_v1 = vpack.c.bf16 %v1917_v59, %v1915_v49  ;;  %v944_v56 = vmul.f32 1.442695, %v913_v63  ;;  %v948_v49 = vld [vmem:[#allocation4 + $0x10] sm:$0xff] }
 0x462   : > { %1926 = vpow2.f32 %v934_v37  ;;  %v910_v26 = vsub.f32 %v2387_v40, %v881_v36  ;;  %v964_v32 = vmul.f32 %v2530_v12, %v948_v49  ;;  %v949_v37 = vld [vmem:[#allocation4 + $0x18] sm:$0xff]  ;;  %v947_v36 = vld [vmem:[#allocation4 + $0x8] sm:$0xff] }
 0x463   : > { %1769 = vmatprep.mubr.bf16.mxu0 %v1157_v1  ;;  %1928 = vpow2.f32 %v940_v62  ;;  %v965_v63 = vmul.f32 %v2516_v2, %v949_v37 }
 0x464   : > { %v1919_v43 = vpop.eup %1918  ;;  %v938_v42 = vmul.f32 1.442695, %v910_v26 }
 0x465   : > { %992 = vadd.xlane.f32.xlu1 %v1919_v43  ;;  %v891_v27 = vpop.permute.xlu1 %890  ;;  %v1158_v34 = vpack.c.bf16 %v1919_v43, %v1913_v15  ;;  %v1921_v28 = vpop.eup %1920  ;;  %v963_v43 = vmul.f32 %v2522_v0, %v947_v36  ;;  %v953_v0 = vld [vmem:[#allocation4 + $0x38] sm:$0xff]  ;;  %v958_v36 = vld [vmem:[#allocation4 + $0x60] sm:$0xff] }
 0x466   : > { %1930 = vpow2.f32 %v938_v42  ;;  %v912_v60 = vsub.f32 %v2385_v39, %v891_v27  ;;  %v2590_v15 = vpop.permute.xlu0 %1061 }
 0x467   : > { %1770 = vmatmul.mubr.bf16.gmra.mrb[20].mxu0 %v1158_v34  ;;  %1932 = vpow2.f32 %v944_v56  ;;  %v968_v56 = vmul.f32 %v2544_v19, %v952_v46  ;;  %v950_v34 = vld [vmem:[#allocation4 + $0x20] sm:$0xff] }
 0x468   : > { %v1923_v55 = vpop.eup %1922  ;;  %v942_v41 = vmul.f32 1.442695, %v912_v60  ;;  %v966_v2 = vmul.f32 %v2538_v3, %v950_v34  ;;  %v1044_v34 = vld [vmem:[#allocation5 + $0x8] sm:$0xff] }
 0x469   : > { %988 = vadd.xlane.f32.xlu1 %v1917_v59  ;;  %v1159_v58 = vpack.c.bf16 %v1921_v28, %v1923_v55  ;;  %v1925_v40 = vpop.eup %1924  ;;  %v2592_v18 = vpop.permute.xlu1 %1066 }
 0x46a   : > { %1934 = vpow2.f32 %v942_v41  ;;  %v2594_v24 = vpop.permute.xlu0 %1076  ;;  %v969_v41 = vmul.f32 %v2532_v13, %v953_v0  ;;  %v954_v13 = vld [vmem:[#allocation4 + $0x40] sm:$0xff]  ;;  %v1140_v0 = vmul.f32 %v2592_v18, %v1044_v34 }
 0x46b   : > { %1773 = vmatprep.mubr.bf16.mxu0 %v1159_v58  ;;  %1936 = vpow2.f32 %v814_v11  ;;  %v955_v11 = vld [vmem:[#allocation4 + $0x48] sm:$0xff] }
 0x46c   : > { %v1927_v4 = vpop.eup %1926  ;;  %1938 = vpow2.f32 %v816_v9  ;;  %v971_v52 = vmul.f32 %v2546_v20, %v955_v11 }
 0x46d   : > { %1000 = vadd.xlane.f32.xlu1 %v1925_v40  ;;  %998 = vadd.xlane.f32.xlu0 %v1927_v4  ;;  %v1160_v5 = vpack.c.bf16 %v1925_v40, %v1927_v4  ;;  %v1929_v29 = vpop.eup %1928  ;;  %v2596_v51 = vpop.permute.xlu1 %1071  ;;  %v951_v40 = vld [vmem:[#allocation4 + $0x28] sm:$0xff] }
 0x46e   : > { %v2598_v50 = vpop.permute.xlu0 %1086  ;;  %v967_v19 = vmul.f32 %v2524_v8, %v951_v40  ;;  %v970_v8 = vmul.f32 %v2556_v22, %v954_v13  ;;  %v959_v22 = vld [vmem:[#allocation4 + $0x68] sm:$0xff] }
 0x46f   : > { %1774 = vmatmul.mubr.bf16.gmra.mrb[24].mxu0 %v1160_v5 }
 0x470   : > { %v1931_v6 = vpop.eup %1930 }
 0x471   : > { %996 = vadd.xlane.f32.xlu1 %v1921_v28  ;;  %994 = vadd.xlane.f32.xlu0 %v1923_v55  ;;  %v1161_v39 = vpack.c.bf16 %v1929_v29, %v1931_v6  ;;  %v1933_v61 = vpop.eup %1932  ;;  %v2600_v17 = vpop.permute.xlu1 %1081 }
 0x472   : > { %v2602_v23 = vpop.permute.xlu0 %1096 }
 0x473   : > { %1777 = vmatprep.mubr.bf16.mxu0 %v1161_v39 }
 0x474   : > { %v1935_v30 = vpop.eup %1934 }
 0x475   : > { %1008 = vadd.xlane.f32.xlu1 %v1933_v61  ;;  %1006 = vadd.xlane.f32.xlu0 %v1935_v30  ;;  %v1162_v10 = vpack.c.bf16 %v1933_v61, %v1935_v30  ;;  %v2584_v14 = vpop.eup %1936  ;;  %v2604_v44 = vpop.permute.xlu1 %1091 }
 0x476   : > { %v2587_v31 = vpop.eup %1938  ;;  %v2606_v35 = vpop.permute.xlu0 %1116 }
 0x477   : > { %1778 = vmatmul.mubr.bf16.gmra.mrb[28].mxu0 %v1162_v10 }
 0x479   : > { %1004 = vadd.xlane.f32.xlu1 %v1929_v29  ;;  %1002 = vadd.xlane.f32.xlu0 %v1931_v6  ;;  %v2608_v45 = vpop.permute.xlu1 %1111  ;;  %v956_v29 = vld [vmem:[#allocation4 + $0x50] sm:$0xff]  ;;  %v957_v6 = vld [vmem:[#allocation4 + $0x58] sm:$0xff] }
 0x47a   : > { %v2610_v33 = vpop.permute.xlu0 %1106  ;;  %v972_v3 = vmul.f32 %v2550_v16, %v956_v29  ;;  %v973_v61 = vmul.f32 %v2540_v7, %v957_v6  ;;  %v961_v16 = vld [vmem:[#allocation4 + $0x78] sm:$0xff] }
 0x47b   : > { %v977_v37 = vmul.f32 %v2587_v31, %v961_v16  ;;  %v1050_v29 = vld [vmem:[#allocation5 + $0x38] sm:$0xff] }
 0x47c   : > { %v1146_v18 = vmul.f32 %v2602_v23, %v1050_v29 }
 0x47d   : > { %v2612_v47 = vpop.permute.xlu1 %1101 }
 0x47e   : > { %v2614_v48 = vpop.permute.xlu0 %1126 }
 0x481   : > { %v2616_v38 = vpop.permute.xlu1 %1121 }
 0x48a   : > { %1131 = vperm.xlu1 %1875, %v2584_v14  }
 0x48f   : > { %1136 = vperm.xlu0 %1874, %v2587_v31   ;;  %v1045_v31 = vld [vmem:[#allocation5 + $0x10] sm:$0xff] }
 0x4d9   : > { %v983_v53 = vpop.xlane.xlu0 %982 }
 0x4da   : > { %v1012_v57 = vadd.f32 %v983_v53, %v964_v32  ;;  %v979_v59 = vpop.xlane.xlu1 %978 }
 0x4db   : > { %v1010_v62 = vadd.f32 %v979_v59, %v962_v54  ;;  %v960_v54 = vld [vmem:[#allocation4 + $0x70] sm:$0xff] }
 0x4dc   : > { %1029 = vst.msk [vmem:[#allocation4 + $0x10] sm:$0xff] %vm1026_vm1, %v1012_v57  ;;  %v976_v59 = vmul.f32 %v2584_v14, %v960_v54 }
 0x4dd   : > { %1027 = vst.msk [vmem:[#allocation4] sm:$0xff] %vm1026_vm1, %v1010_v62 }
 0x4de   : > { %v985_v1 = vpop.xlane.xlu1 %984 }
 0x4df   : > { %v1013_v26 = vadd.f32 %v985_v1, %v965_v63 }
 0x4e1   : > { %1030 = vst.msk [vmem:[#allocation4 + $0x18] sm:$0xff] %vm1026_vm1, %v1013_v26  ;;  %v981_v12 = vpop.xlane.xlu0 %980  ;;  %v974_v26 = vmul.f32 %v2559_v25, %v958_v36 }
 0x4e2   : > { %v1011_v42 = vadd.f32 %v981_v12, %v963_v43  ;;  %v975_v43 = vmul.f32 %v2552_v21, %v959_v22 }
 0x4e4   : > { %1028 = vst.msk [vmem:[#allocation4 + $0x8] sm:$0xff] %vm1026_vm1, %v1011_v42 }
 0x4e6   : > { %v991_v27 = vpop.xlane.xlu0 %990 }
 0x4e7   : > { %v1016_v60 = vadd.f32 %v991_v27, %v968_v56  ;;  %v1043_v56 = vld [vmem:[#allocation5] sm:$0xff]  ;;  %v1046_v27 = vld [vmem:[#allocation5 + $0x18] sm:$0xff] }
 0x4e8   : > { %v1142_v25 = vmul.f32 %v2594_v24, %v1046_v27 }
 0x4e9   : > { %1033 = vst.msk [vmem:[#allocation4 + $0x30] sm:$0xff] %vm1026_vm1, %v1016_v60  ;;  %v1141_v60 = vmul.f32 %v2596_v51, %v1045_v31  ;;  %v1047_v51 = vld [vmem:[#allocation5 + $0x20] sm:$0xff] }
 0x4ea   : > { %v987_v28 = vpop.xlane.xlu0 %986  ;;  %v1143_v24 = vmul.f32 %v2600_v17, %v1047_v51  ;;  %v1052_v17 = vld [vmem:[#allocation5 + $0x48] sm:$0xff] }
 0x4eb   : > { %v1014_v55 = vadd.f32 %v987_v28, %v966_v2  ;;  %v1139_v2 = vmul.f32 %v2590_v15, %v1043_v56  ;;  %v1048_v15 = vld [vmem:[#allocation5 + $0x28] sm:$0xff] }
 0x4ed   : > { %1031 = vst.msk [vmem:[#allocation4 + $0x20] sm:$0xff] %vm1026_vm1, %v1014_v55 }
 0x4f2   : > { %v993_v58 = vpop.xlane.xlu1 %992 }
 0x4f3   : > { %v1017_v4 = vadd.f32 %v993_v58, %v969_v41 }
 0x4f5   : > { %1034 = vst.msk [vmem:[#allocation4 + $0x38] sm:$0xff] %vm1026_vm1, %v1017_v4 }
 0x4f6   : > { %v989_v5 = vpop.xlane.xlu1 %988 }
 0x4f7   : > { %v1015_v39 = vadd.f32 %v989_v5, %v967_v19  ;;  %v1049_v5 = vld [vmem:[#allocation5 + $0x30] sm:$0xff] }
 0x4f8   : > { %v1145_v6 = vmul.f32 %v2604_v44, %v1049_v5  ;;  %v1054_v44 = vld [vmem:[#allocation5 + $0x58] sm:$0xff] }
 0x4f9   : > { %1032 = vst.msk [vmem:[#allocation4 + $0x28] sm:$0xff] %vm1026_vm1, %v1015_v39 }
 0x4fa   : > { %v999_v30 = vpop.xlane.xlu0 %998  ;;  %v1001_v10 = vpop.xlane.xlu1 %1000 }
 0x4fb   : > { %v1020_v9 = vadd.f32 %v999_v30, %v972_v3  ;;  %v1021_v49 = vadd.f32 %v1001_v10, %v973_v61  ;;  %v1144_v30 = vmul.f32 %v2598_v50, %v1048_v15  ;;  %v1150_v50 = vmul.f32 %v2606_v35, %v1054_v44 }
 0x4fd   : > { %1037 = vst.msk [vmem:[#allocation4 + $0x50] sm:$0xff] %vm1026_vm1, %v1020_v9  ;;  %1038 = vst.msk [vmem:[#allocation4 + $0x58] sm:$0xff] %vm1026_vm1, %v1021_v49  ;;  %v1053_v49 = vld [vmem:[#allocation5 + $0x50] sm:$0xff] }
 0x4fe   : > { %v995_v32 = vpop.xlane.xlu0 %994  ;;  %v997_v53 = vpop.xlane.xlu1 %996 }
 0x4ff   : > { %v1018_v57 = vadd.f32 %v995_v32, %v970_v8  ;;  %v1019_v7 = vadd.f32 %v997_v53, %v971_v52  ;;  %v1051_v52 = vld [vmem:[#allocation5 + $0x40] sm:$0xff]  ;;  %v1149_v32 = vmul.f32 %v2608_v45, %v1053_v49  ;;  %v1058_v45 = vld [vmem:[#allocation5 + $0x78] sm:$0xff] }
 0x500   : > { %v1147_v23 = vmul.f32 %v2612_v47, %v1051_v52 }
 0x501   : > { %1035 = vst.msk [vmem:[#allocation4 + $0x40] sm:$0xff] %vm1026_vm1, %v1018_v57  ;;  %1036 = vst.msk [vmem:[#allocation4 + $0x48] sm:$0xff] %vm1026_vm1, %v1019_v7  ;;  %v1148_v57 = vmul.f32 %v2610_v33, %v1052_v17 }
 0x502   : > { %v1007_v62 = vpop.xlane.xlu0 %1006  ;;  %v1009_v63 = vpop.xlane.xlu1 %1008 }
 0x503   : > { %v1024_v1 = vadd.f32 %v1007_v62, %v976_v59  ;;  %v1025_v20 = vadd.f32 %v1009_v63, %v977_v37  ;;  %v1057_v63 = vld [vmem:[#allocation5 + $0x70] sm:$0xff] }
 0x505   : > { %1041 = vst.msk [vmem:[#allocation4 + $0x70] sm:$0xff] %vm1026_vm1, %v1024_v1  ;;  %1042 = vst.msk [vmem:[#allocation4 + $0x78] sm:$0xff] %vm1026_vm1, %v1025_v20  ;;  %v1055_v1 = vld [vmem:[#allocation5 + $0x60] sm:$0xff]  ;;  %v1056_v20 = vld [vmem:[#allocation5 + $0x68] sm:$0xff] }
 0x506   : > { %v1003_v12 = vpop.xlane.xlu0 %1002  ;;  %v1005_v42 = vpop.xlane.xlu1 %1004 }
 0x507   : > { %v1022_v46 = vadd.f32 %v1003_v12, %v974_v26  ;;  %v1023_v14 = vadd.f32 %v1005_v42, %v975_v43  ;;  %v1151_v26 = vmul.f32 %v2616_v38, %v1055_v1  ;;  %v1328_v38 = vld [vmem:[#allocation4] sm:$0xff] (!%p1582_p1) }
 0x509   : > { %1039 = vst.msk [vmem:[#allocation4 + $0x60] sm:$0xff] %vm1026_vm1, %v1022_v46  ;;  %1040 = vst.msk [vmem:[#allocation4 + $0x68] sm:$0xff] %vm1026_vm1, %v1023_v14  ;;  %v1152_v46 = vmul.f32 %v2614_v48, %v1056_v20  ;;  %v1331_v48 = vld [vmem:[#allocation4 + $0x18] sm:$0xff] (!%p1582_p1) }
 0x50a   : > { %v1132_v36 = vpop.permute.xlu1 %1131 }
 0x50b   : > { %v1153_v35 = vmul.f32 %v1132_v36, %v1057_v63 }
 0x50c   : > { %v1343_v51 = vld [vmem:[#allocation4 + $0x78] sm:$0xff] (!%p1582_p1)  ;;  %v1342_v29 = vld [vmem:[#allocation4 + $0x70] sm:$0xff] (!%p1582_p1) }
 0x50e   : > { %v1137_v47 = vpop.permute.xlu0 %1136 }
 0x50f   : > { %v1154_v33 = vmul.f32 %v1137_v47, %v1058_v45 }
 0x510   : > { %v1340_v5 = vld [vmem:[#allocation4 + $0x60] sm:$0xff] (!%p1582_p1) }
 0x52a   : > { %v1767_v28 = vpop.f32.mrb[16].mxu0 }
 0x52b   : > { %v1262_v21 = vadd.f32 %v1767_v28, %v1141_v60  ;;  %v1197_v55 = vpop.f32.mrb[17].mxu0  ;;  %v1330_v60 = vld [vmem:[#allocation4 + $0x10] sm:$0xff] (!%p1582_p1)  ;;  %v1329_v28 = vld [vmem:[#allocation4 + $0x8] sm:$0xff] (!%p1582_p1) }
 0x52c   : > { %v1260_v41 = vadd.f32 %v1197_v55, %v1139_v2  ;;  %v1768_v58 = vpop.f32.mrb[18].mxu0  ;;  %v2073_v2 = vmov (!%p1582_p1), 0   ;;  %v1335_v55 = vld [vmem:[#allocation4 + $0x38] sm:$0xff] (!%p1582_p1) }
 0x52d   : > { %1278 = vst [vmem:[#allocation5 + $0x10] sm:$0xff] %v1262_v21  ;;  %v1263_v40 = vadd.f32 %v1768_v58, %v1142_v25  ;;  %v1200_v4 = vpop.f32.mrb[19].mxu0  ;;  %1941 = vset.pattern.permute.xlu1 (!%p1582_p1), %v2073_v2  ;;  %1940 = vset.pattern.permute.xlu0 (!%p1582_p1), %v2073_v2  ;;  %v1333_v25 = vld [vmem:[#allocation4 + $0x28] sm:$0xff] (!%p1582_p1)  ;;  %v1332_v21 = vld [vmem:[#allocation4 + $0x20] sm:$0xff] (!%p1582_p1) }
 0x52e   : > { %1276 = vst [vmem:[#allocation5] sm:$0xff] %v1260_v41  ;;  %v1261_v19 = vadd.f32 %v1200_v4, %v1140_v0  ;;  %1356 = vperm.xlu1 (!%p1582_p1), %1941, %v1330_v60   ;;  %1346 = vperm.xlu0 (!%p1582_p1), %1940, %v1328_v38   ;;  %v1334_v0 = vld [vmem:[#allocation4 + $0x30] sm:$0xff] (!%p1582_p1)  ;;  %v1337_v41 = vld [vmem:[#allocation4 + $0x48] sm:$0xff] (!%p1582_p1)  ;;  %v1336_v58 = vld [vmem:[#allocation4 + $0x40] sm:$0xff] (!%p1582_p1) }
 0x52f   : > { %1279 = vst [vmem:[#allocation5 + $0x18] sm:$0xff] %v1263_v40  ;;  %v1339_v40 = vld [vmem:[#allocation4 + $0x58] sm:$0xff] (!%p1582_p1)  ;;  %v1338_v4 = vld [vmem:[#allocation4 + $0x50] sm:$0xff] (!%p1582_p1) }
 0x530   : > { %1277 = vst [vmem:[#allocation5 + $0x8] sm:$0xff] %v1261_v19  ;;  %v1341_v19 = vld [vmem:[#allocation4 + $0x68] sm:$0xff] (!%p1582_p1) }
 0x532   : > { %1361 = vperm.xlu1 (!%p1582_p1), %1941, %v1331_v48   ;;  %1351 = vperm.xlu0 (!%p1582_p1), %1940, %v1329_v28  }
 0x536   : > { %1371 = vperm.xlu1 (!%p1582_p1), %1941, %v1333_v25   ;;  %1366 = vperm.xlu0 (!%p1582_p1), %1940, %v1332_v21   ;;  %v1315_v52 = vld [vmem:[#allocation5 + $0x18] sm:$0xff] (!%p1582_p1) }
 0x537   : > { %v1313_v44 = vld [vmem:[#allocation5 + $0x8] sm:$0xff] (!%p1582_p1) }
 0x53a   : > { %v1771_v39 = vpop.f32.mrb[20].mxu0  ;;  %1381 = vperm.xlu1 (!%p1582_p1), %1941, %v1335_v55   ;;  %1376 = vperm.xlu0 (!%p1582_p1), %1940, %v1334_v0  }
 0x53b   : > { %v1266_v3 = vadd.f32 %v1771_v39, %v1145_v6  ;;  %v1213_v61 = vpop.f32.mrb[21].mxu0 }
 0x53c   : > { %v1264_v10 = vadd.f32 %v1213_v61, %v1143_v24  ;;  %v1772_v13 = vpop.f32.mrb[22].mxu0  ;;  %v1314_v61 = vld [vmem:[#allocation5 + $0x10] sm:$0xff] (!%p1582_p1) }
 0x53d   : > { %1282 = vst [vmem:[#allocation5 + $0x30] sm:$0xff] %v1266_v3  ;;  %v1267_v11 = vadd.f32 %v1772_v13, %v1146_v18  ;;  %v1216_v9 = vpop.f32.mrb[23].mxu0 }
 0x53e   : > { %1280 = vst [vmem:[#allocation5 + $0x20] sm:$0xff] %v1264_v10  ;;  %v1265_v8 = vadd.f32 %v1216_v9, %v1144_v30  ;;  %1391 = vperm.xlu1 (!%p1582_p1), %1941, %v1337_v41   ;;  %1386 = vperm.xlu0 (!%p1582_p1), %1940, %v1336_v58   ;;  %v1312_v30 = vld [vmem:[#allocation5] sm:$0xff] (!%p1582_p1) }
 0x53f   : > { %1283 = vst [vmem:[#allocation5 + $0x38] sm:$0xff] %v1267_v11 }
 0x540   : > { %1281 = vst [vmem:[#allocation5 + $0x28] sm:$0xff] %v1265_v8 }
 0x542   : > { %v1775_v53 = vpop.f32.mrb[24].mxu0  ;;  %1401 = vperm.xlu1 (!%p1582_p1), %1941, %v1339_v40   ;;  %1396 = vperm.xlu0 (!%p1582_p1), %1940, %v1338_v4  }
 0x543   : > { %v1270_v54 = vadd.f32 %v1775_v53, %v1149_v32  ;;  %v1229_v16 = vpop.f32.mrb[25].mxu0 }
 0x544   : > { %v1268_v7 = vadd.f32 %v1229_v16, %v1147_v23  ;;  %v1776_v59 = vpop.f32.mrb[26].mxu0  ;;  %v1318_v1 = vld [vmem:[#allocation5 + $0x30] sm:$0xff] (!%p1582_p1) }
 0x545   : > { %1286 = vst [vmem:[#allocation5 + $0x50] sm:$0xff] %v1270_v54  ;;  %v1271_v37 = vadd.f32 %v1776_v59, %v1150_v50  ;;  %v1232_v62 = vpop.f32.mrb[27].mxu0 }
 0x546   : > { %1284 = vst [vmem:[#allocation5 + $0x40] sm:$0xff] %v1268_v7  ;;  %v1269_v22 = vadd.f32 %v1232_v62, %v1148_v57  ;;  %1411 = vperm.xlu1 (!%p1582_p1), %1941, %v1341_v19   ;;  %1406 = vperm.xlu0 (!%p1582_p1), %1940, %v1340_v5   ;;  %v1316_v57 = vld [vmem:[#allocation5 + $0x20] sm:$0xff] (!%p1582_p1) }
 0x547   : > { %1287 = vst [vmem:[#allocation5 + $0x58] sm:$0xff] %v1271_v37  ;;  %v1317_v16 = vld [vmem:[#allocation5 + $0x28] sm:$0xff] (!%p1582_p1) }
 0x548   : > { %1285 = vst [vmem:[#allocation5 + $0x48] sm:$0xff] %v1269_v22  ;;  %v1319_v22 = vld [vmem:[#allocation5 + $0x38] sm:$0xff] (!%p1582_p1) }
 0x54a   : > { %v1779_v43 = vpop.f32.mrb[28].mxu0  ;;  %1311 = sbr.rel (%p1582_p1) target bundleno = 1497 (0x5d9), region = 44  ;;  %1421 = vperm.xlu1 (!%p1582_p1), %1941, %v1343_v51   ;;  %1416 = vperm.xlu0 (!%p1582_p1), %1940, %v1342_v29  }
 0x54b   : > { %v1274_v12 = vadd.f32 %v1779_v43, %v1153_v35  ;;  %v1245_v42 = vpop.f32.mrb[29].mxu0 }
 0x54c   : > { %v1272_v14 = vadd.f32 %v1245_v42, %v1151_v26  ;;  %v1780_v31 = vpop.f32.mrb[30].mxu0  ;;  %v1322_v60 = vld [vmem:[#allocation5 + $0x50] sm:$0xff] (!%p1582_p1) }
 0x54d   : > { %1290 = vst [vmem:[#allocation5 + $0x70] sm:$0xff] %v1274_v12  ;;  %v1275_v56 = vadd.f32 %v1780_v31, %v1154_v33  ;;  %v1248_v27 = vpop.f32.mrb[31].mxu0  ;;  %v1320_v12 = vld [vmem:[#allocation5 + $0x40] sm:$0xff] (!%p1582_p1) }
 0x54e   : > { %1288 = vst [vmem:[#allocation5 + $0x60] sm:$0xff] %v1272_v14  ;;  %v1273_v34 = vadd.f32 %v1248_v27, %v1152_v46 }
 0x54f   : > { %1291 = vst [vmem:[#allocation5 + $0x78] sm:$0xff] %v1275_v56  ;;  %v1321_v33 = vld [vmem:[#allocation5 + $0x48] sm:$0xff] (!%p1582_p1) }
 0x550   : > { %1289 = vst [vmem:[#allocation5 + $0x68] sm:$0xff] %v1273_v34  ;;  %v1323_v34 = vld [vmem:[#allocation5 + $0x58] sm:$0xff] (!%p1582_p1) }
 0x554   : > { %v1326_v4 = vld [vmem:[#allocation5 + $0x70] sm:$0xff] }
 0x555   : > { %v1324_v21 = vld [vmem:[#allocation5 + $0x60] sm:$0xff] }
 0x556   : > { %v1327_v40 = vld [vmem:[#allocation5 + $0x78] sm:$0xff] }
 0x557   : > { %v1325_v25 = vld [vmem:[#allocation5 + $0x68] sm:$0xff] }
 0x5ad   : > { %v1357_v15 = vpop.permute.xlu1 %1356  ;;  %v1347_v6 = vpop.permute.xlu0 %1346 }
 0x5ae   : > { %1942 = vrcp.f32 %v1357_v15 }
 0x5af   : > { %1944 = vrcp.f32 %v1347_v6 }
 0x5b1   : > { %v1362_v24 = vpop.permute.xlu1 %1361  ;;  %v1352_v39 = vpop.permute.xlu0 %1351 }
 0x5b2   : > { %1946 = vrcp.f32 %v1362_v24 }
 0x5b3   : > { %1948 = vrcp.f32 %v1352_v39 }
 0x5b5   : > { %v1372_v18 = vpop.permute.xlu1 %1371  ;;  %v1367_v3 = vpop.permute.xlu0 %1366 }
 0x5b6   : > { %1950 = vrcp.f32 %v1372_v18 }
 0x5b7   : > { %1952 = vrcp.f32 %v1367_v3 }
 0x5b8   : > { %v1943_v10 = vpop.eup %1942 }
 0x5b9   : > { %v1945_v13 = vpop.eup %1944  ;;  %v1429_v11 = vmul.f32 %v1943_v10, %v1314_v61  ;;  %v1382_v9 = vpop.permute.xlu1 %1381 }
 0x5ba   : > { %v1377_v49 = vpop.permute.xlu0 %1376  ;;  %v1425_v8 = vmul.f32 %v1945_v13, %v1312_v30  ;;  %1954 = vrcp.f32 %v1382_v9 }
 0x5bb   : > { %1458 = vst [vmem:[%s2186_s30 + $0x10] sm:$0xff] %v1429_v11  ;;  %1956 = vrcp.f32 %v1377_v49 }
 0x5bc   : > { %v1947_v17 = vpop.eup %1946  ;;  %1456 = vst [vmem:[%s2186_s30] sm:$0xff] %v1425_v8 }
 0x5bd   : > { %v1949_v32 = vpop.eup %1948  ;;  %v1431_v23 = vmul.f32 %v1947_v17, %v1315_v52  ;;  %v1392_v53 = vpop.permute.xlu1 %1391 }
 0x5be   : > { %v1387_v50 = vpop.permute.xlu0 %1386  ;;  %v1427_v54 = vmul.f32 %v1949_v32, %v1313_v44  ;;  %1958 = vrcp.f32 %v1392_v53 }
 0x5bf   : > { %1459 = vst [vmem:[%s2186_s30 + $0x18] sm:$0xff] %v1431_v23  ;;  %1960 = vrcp.f32 %v1387_v50 }
 0x5c0   : > { %v1951_v7 = vpop.eup %1950  ;;  %1457 = vst [vmem:[%s2186_s30 + $0x8] sm:$0xff] %v1427_v54 }
 0x5c1   : > { %v1953_v59 = vpop.eup %1952  ;;  %v1435_v37 = vmul.f32 %v1951_v7, %v1317_v16  ;;  %v1402_v62 = vpop.permute.xlu1 %1401 }
 0x5c2   : > { %v1397_v63 = vpop.permute.xlu0 %1396  ;;  %v1433_v36 = vmul.f32 %v1953_v59, %v1316_v57  ;;  %1962 = vrcp.f32 %v1402_v62 }
 0x5c3   : > { %1461 = vst [vmem:[%s2186_s30 + $0x28] sm:$0xff] %v1435_v37  ;;  %1964 = vrcp.f32 %v1397_v63 }
 0x5c4   : > { %v1955_v45 = vpop.eup %1954  ;;  %1460 = vst [vmem:[%s2186_s30 + $0x20] sm:$0xff] %v1433_v36 }
 0x5c5   : > { %v1957_v47 = vpop.eup %1956  ;;  %v1439_v20 = vmul.f32 %v1955_v45, %v1319_v22  ;;  %v1412_v35 = vpop.permute.xlu1 %1411 }
 0x5c6   : > { %v1407_v26 = vpop.permute.xlu0 %1406  ;;  %v1437_v43 = vmul.f32 %v1957_v47, %v1318_v1  ;;  %1966 = vrcp.f32 %v1412_v35 }
 0x5c7   : > { %1463 = vst [vmem:[%s2186_s30 + $0x38] sm:$0xff] %v1439_v20  ;;  %1968 = vrcp.f32 %v1407_v26 }
 0x5c8   : > { %v1959_v42 = vpop.eup %1958  ;;  %1462 = vst [vmem:[%s2186_s30 + $0x30] sm:$0xff] %v1437_v43 }
 0x5c9   : > { %v1961_v46 = vpop.eup %1960  ;;  %v1443_v14 = vmul.f32 %v1959_v42, %v1321_v33  ;;  %v1422_v31 = vpop.permute.xlu1 %1421 }
 0x5ca   : > { %v1417_v56 = vpop.permute.xlu0 %1416  ;;  %v1441_v27 = vmul.f32 %v1961_v46, %v1320_v12  ;;  %1970 = vrcp.f32 %v1422_v31 }
 0x5cb   : > { %1465 = vst [vmem:[%s2186_s30 + $0x48] sm:$0xff] %v1443_v14  ;;  %1972 = vrcp.f32 %v1417_v56 }
 0x5cc   : > { %v1963_v38 = vpop.eup %1962  ;;  %1464 = vst [vmem:[%s2186_s30 + $0x40] sm:$0xff] %v1441_v27 }
 0x5cd   : > { %v1965_v2 = vpop.eup %1964  ;;  %v1447_v48 = vmul.f32 %v1963_v38, %v1323_v34 }
 0x5ce   : > { %v1445_v28 = vmul.f32 %v1965_v2, %v1322_v60 }
 0x5cf   : > { %1467 = vst [vmem:[%s2186_s30 + $0x58] sm:$0xff] %v1447_v48 }
 0x5d0   : > { %v1967_v55 = vpop.eup %1966  ;;  %1466 = vst [vmem:[%s2186_s30 + $0x50] sm:$0xff] %v1445_v28 }
 0x5d1   : > { %v1969_v0 = vpop.eup %1968  ;;  %v1451_v41 = vmul.f32 %v1967_v55, %v1325_v25 }
 0x5d2   : > { %v1449_v58 = vmul.f32 %v1969_v0, %v1324_v21 }
 0x5d3   : > { %1469 = vst [vmem:[%s2186_s30 + $0x68] sm:$0xff] %v1451_v41 }
 0x5d4   : > { %v1971_v19 = vpop.eup %1970  ;;  %1468 = vst [vmem:[%s2186_s30 + $0x60] sm:$0xff] %v1449_v58 }
 0x5d5   : > { %v1973_v5 = vpop.eup %1972  ;;  %v1455_v51 = vmul.f32 %v1971_v19, %v1327_v40 }
 0x5d6   : > { %v1453_v29 = vmul.f32 %v1973_v5, %v1326_v4 }
 0x5d7   : > { %1471 = vst [vmem:[%s2186_s30 + $0x78] sm:$0xff] %v1455_v51 }
 0x5d8   : > { %1470 = vst [vmem:[%s2186_s30 + $0x70] sm:$0xff] %v1453_v29 }
 0x5d9 PF: > { %s1588_s18 = sshll.u32 %s2056_s19, 11  ;;  %s1486_s14 = sshll.u32 %s2186_s30, 4  ;;  %s2688_s14 = int_to_ptr.vmem [resolvable:$true] %s1486_s14 }
 0x5da   : > { %s2685_s12 = scalar_lea.hbm %s2748_s4, %s1588_s18  ;;  %s2754_s26 = sand.u32 1, %s2044_s16  }
 0x5db   : > { %s2692_s29 = scalar_lea.sflag [#allocation7], %s2754_s26  ;;  %s1974_s6 = scalar_lea.vmem %s2688_s14, 2048 }
 0x5dc   : > { %p1975_p2 = scmp.ne.s32.totalorder %s2688_s14, %s1974_s6  ;;  %s2074_s19 = smov [#allocation6]  }
 0x5dd   : > { %s1978_s23 = sshll.u32 %s2074_s19, 4  ;;  %s1979_s23 = int_to_ptr.vmem [resolvable:$false] %s1978_s23 }
 0x5de   : > { %p1976_p4 = pnand %p1975_p2, %p2151_p3  ;;  %s1980_s24 = scalar_lea.vmem %s1979_s23, 4096 }
 0x5df   : > { %p1981_p6 = scmp.lt.s32.totalorder %s2688_s14, %s1979_s23  ;;  %p1982_p7 = scmp.lt.s32.totalorder %s1980_s24, %s1974_s6 }
 0x5e0   : > { %p1977_p5 = pneg %p1976_p4 }
 0x5e1   : > { %p1983_p8 = por %p1982_p7, %p1981_p6 }
 0x5e3   : > { %p1984_p10 = pnand %p1983_p8, %p1977_p5 }
 0x5e5   : > { %1987 = shalt.err (!%p1984_p10)
}
 0x5e6   : > { %s1988_s30 = scalar_lea.hbm %s2685_s12, 2048  ;;  %s1992_s9 = scalar_lea.hbm %s2748_s4, 4096 }
 0x5e7   : > { %p1989_p11 = scmp.ne.s32.totalorder %s2685_s12, %s1988_s30  ;;  %p1993_p0 = scmp.lt.u32.totalorder %s2685_s12, %s2748_s4 }
 0x5e8   : > { %p1994_p1 = scmp.lt.u32.totalorder %s1992_s9, %s1988_s30  ;;  %p1996_p4 = scmp.lt.u32.totalorder %s1988_s30, %s2685_s12 }
 0x5e9   : > { %p1990_p12 = pnand %p1989_p11, %p2151_p3 }
 0x5ea   : > { %p1995_p2 = por %p1994_p1, %p1993_p0 }
 0x5eb   : > { %p1991_p13 = pneg %p1990_p12 }
 0x5ec   : > { %p1997_p5 = por %p1996_p4, %p1995_p2 }
 0x5ee   : > { %p1998_p6 = pnand %p1997_p5, %p1991_p13 }
 0x5f0   : > { %2001 = shalt.err (!%p1998_p6)
}
 0x5f1   : > { %s2075_s13 = smov 128   ;;  %s2076_s8 = smov 8  }
 0x5f2   : > { %1797 = dma.vmem_to_hbm [thread:$0]  (%p2151_p3), %s2688_s14, 2048, %s2685_s12, %s2692_s29, %s2075_s13, %s2075_s13, %s2076_s8  }
 0x5f3 PF: > { %p1803_p7 = scmp.ge.s32.totalorder %s2068_s22, 2  ;;  %s1501_s26 = sand.u32 1, %s2040_s15  }
 0x5f4   : > { %s1502_s6 = scalar_lea.sflag [#allocation7], %s1501_s26 }
 0x5f5   : > { %p1800_p8 = pnand %p1803_p7, %p2161_p9 }
 0x5f7   : > { %2035 = dma.done.wait (!%p1800_p8), %s1502_s6, 2048  }
 0x5f8   : > { %2037 = vsyncadd (!%p1800_p8), %s1502_s6, 4294965248  ;;  %s17_s22 = sadd.s32 1, %s2068_s22   ;;  %s2755_s27 = sld [smem:[#allocation9_spill]] }
 0x5f9   : > { %p14_p10 = scmp.ge.s32.totalorder %s17_s22, 6   ;;  %s2756_s15 = smov %s2044_s16 }
 0x5fa   : > { %s2757_s16 = smov %s2048_s17  ;;  %s2758_s17 = smov %s2169_s5 }
 0x5fb   : > { %s2759_s18 = smov %s2060_s20  ;;  %s2760_s19 = smov %s2064_s21 }
 0x5fc   : > { %s2761_s20 = smov %s2764_s25  ;;  %16 = sbr.rel (!%p14_p10) target bundleno = 5 (0x5), region = 82 }
 0x5fe   : > { %s2762_s21 = smov %s2755_s27 }
 0x603   :  { %1507 = vsyncpa [#allocation7], 1 }
 0x604   :  { %1509 = vsyncpa [#allocation7 + $0x1], 1 }

</bundles_post_ra>
